<compile_context>
chip_gen: v6e
topology: v6e:2x2x1
jax: 0.10.0
libtpu: 0.0.40
codegen_flags: <defaults>
</compile_context>

<pallas_src>
import math
from functools import partial

import jax
import jax.numpy as jnp
from jax import lax
from jax.experimental import pallas as pl
from jax.experimental.pallas import tpu as pltpu


def _attn_kernel(x_ref, wqkv_ref, wproj_ref, o_ref, y_scratch, *, n_head):
    # x_ref:     (1, T, C)   bf16  -- full sequence for this batch element
    # wqkv_ref:  (C, 3C)     bf16  -- fused QKV projection (in, out), cols [q|k|v]
    # wproj_ref: (C, C)      bf16  -- output projection (in, out)
    # o_ref:     (1, T, C)   f32
    # y_scratch: (T, C)      bf16  -- per-head attention outputs, concatenated
    T = x_ref.shape[1]
    C = x_ref.shape[2]
    hd = C // n_head
    scale = 1.0 / math.sqrt(hd)

    x = x_ref[0]  # (T, C) bf16

    # One fused QKV projection: (T, C) @ (C, 3C) -> (T, 3C), f32 accumulation.
    qkv = jnp.dot(x, wqkv_ref[...], preferred_element_type=jnp.float32)

    # Three casts total (v5e-friendly); 1/sqrt(hd) folded into q before bf16.
    q_all = (qkv[:, 0 * C:1 * C] * scale).astype(jnp.bfloat16)  # (T, C)
    k_all = qkv[:, 1 * C:2 * C].astype(jnp.bfloat16)            # (T, C)
    v_all = qkv[:, 2 * C:3 * C].astype(jnp.bfloat16)            # (T, C)

    # Causal mask, computed once (single grid step covers all T query rows).
    row = lax.broadcasted_iota(jnp.int32, (T, T), 0)
    col = lax.broadcasted_iota(jnp.int32, (T, T), 1)
    causal = col <= row

    for h in range(n_head):  # static unroll (n_head=4); all slices are static
        sl = slice(h * hd, (h + 1) * hd)
        qh = q_all[:, sl]  # (T, hd) bf16 -- 16-lane slice (XLU)
        kh = k_all[:, sl]
        vh = v_all[:, sl]

        # NT matmul: contract head_dim of both operands; no explicit kh.T.
        att = lax.dot_general(qh, kh, (((1,), (1,)), ((), ())),
                              preferred_element_type=jnp.float32)  # (T, T)

        # NOTE: reference uses masked_fill(..., float(-10)) — NOT -inf.
        att = jnp.where(causal, att, jnp.float32(-10.0))

        # Softmax along keys (f32).
        m = jnp.max(att, axis=-1, keepdims=True)
        p = jnp.exp(att - m)
        denom = jnp.sum(p, axis=-1, keepdims=True)
        p = p * pl.reciprocal(denom, approx=True)

        yh = jnp.dot(p.astype(jnp.bfloat16), vh,
                     preferred_element_type=jnp.float32)  # (T, hd)

        # Head concat via lane-sliced store into VMEM scratch.
        y_scratch[:, sl] = yh.astype(jnp.bfloat16)

    # Single output projection with full K=C contraction.
    o = jnp.dot(y_scratch[...], wproj_ref[...],
                preferred_element_type=jnp.float32)  # (T, C)
    o_ref[0] = o.astype(o_ref.dtype)


def causal_self_attention(x, w_attn, w_proj, *, n_head):
    """x: (B, T, C) f32.  w_attn: (3C, C) torch layout.  w_proj: (C, C) torch layout."""
    B, T, C = x.shape
    assert C % n_head == 0

    # Torch (out, in) -> (in, out) once on the wrapper side.
    #   c_attn (3C, C) -> (C, 3C): columns [0:C]=q, [C:2C]=k, [2C:3C]=v,
    #   with head h at columns h*hd:(h+1)*hd inside each section.
    wqkv_t = jnp.transpose(w_attn).astype(jnp.bfloat16)   # (C, 3C)
    wproj_t = jnp.transpose(w_proj).astype(jnp.bfloat16)  # (C, C)
    x_bf16 = x.astype(jnp.bfloat16)

    kernel = partial(_attn_kernel, n_head=n_head)

    return pl.pallas_call(
        kernel,
        out_shape=jax.ShapeDtypeStruct((B, T, C), jnp.float32),
        grid_spec=pltpu.PrefetchScalarGridSpec(
            num_scalar_prefetch=0,
            grid=(B,),
            in_specs=[
                pl.BlockSpec((1, T, C), lambda b: (b, 0, 0)),      # x
                pl.BlockSpec((C, 3 * C), lambda b: (0, 0)),        # fused Wqkv
                pl.BlockSpec((C, C), lambda b: (0, 0)),            # Wproj
            ],
            out_specs=pl.BlockSpec((1, T, C), lambda b: (b, 0, 0)),
            scratch_shapes=[pltpu.VMEM((T, C), jnp.bfloat16)],
        ),
        compiler_params=pltpu.CompilerParams(
            dimension_semantics=("parallel",),
        ),
    )(x_bf16, wqkv_t, wproj_t)


def _reference(x, w_attn, w_proj, n_head):
    # Pure-JAX (f32) reference of the PyTorch forward pass.
    B, T, C = x.shape
    hd = C // n_head
    qkv = x @ w_attn.T                     # (B, T, 3C)
    q, k, v = jnp.split(qkv, 3, axis=2)
    q = q.reshape(B, T, n_head, hd).transpose(0, 2, 1, 3)
    k = k.reshape(B, T, n_head, hd).transpose(0, 2, 1, 3)
    v = v.reshape(B, T, n_head, hd).transpose(0, 2, 1, 3)
    att = (q @ jnp.swapaxes(k, -2, -1)) * (1.0 / math.sqrt(hd))
    mask = jnp.tril(jnp.ones((T, T), dtype=bool))[None, None]
    att = jnp.where(mask, att, -10.0)
    att = jax.nn.softmax(att, axis=-1)
    y = att @ v
    y = y.transpose(0, 2, 1, 3).reshape(B, T, C)
    return y @ w_proj.T


if __name__ == "__main__":
    # GPTConfig(block_size=64, vocab_size=65, n_layer=4, n_head=4, n_embd=64,
    #           dropout=0.0, bias=False)
    n_head = 4
    n_embd = 64
    B, T, C = 1, 64, n_embd

    key = jax.random.PRNGKey(0)
    k_x, k_attn, k_proj = jax.random.split(key, 3)

    # Deterministic parameter init (torch Linear layout: (out_features, in_features)).
    bound = 1.0 / math.sqrt(n_embd)
    w_attn = jax.random.uniform(k_attn, (3 * n_embd, n_embd), jnp.float32, -bound, bound)
    w_proj = jax.random.uniform(k_proj, (n_embd, n_embd), jnp.float32, -bound, bound)

    # Module uses x = torch.ones(1, 64, 64); perturb deterministically so the
    # softmax isn't degenerate-uniform everywhere.
    x = jnp.ones((B, T, C), jnp.float32) + 0.1 * jax.random.normal(k_x, (B, T, C), jnp.float32)

    out = causal_self_attention(x, w_attn, w_proj, n_head=n_head)
    out = jax.block_until_ready(out)

    # Compare against an f32 reference run on bf16-quantized operands (the
    # kernel feeds the MXU bf16 with f32 accumulation).
    bq = lambda a: a.astype(jnp.bfloat16).astype(jnp.float32)
    ref = _reference(bq(x), bq(w_attn), bq(w_proj), n_head)
    assert out.shape == (B, T, C)
    assert jnp.allclose(out, ref, atol=3e-2, rtol=3e-2), "mismatch vs reference"

    print("KERNEL_OK")
</pallas_src>

<mosaic_0001>
module attributes {stable_mosaic.version = 11 : i64} {
  func.func @_attn_kernel(%arg0: i32, %arg1: memref<1x64x64xbf16, #tpu.memory_space<vmem>>, %arg2: memref<64x192xbf16, #tpu.memory_space<vmem>>, %arg3: memref<64x64xbf16, #tpu.memory_space<vmem>>, %arg4: memref<1x64x64xf32, #tpu.memory_space<vmem>>, %arg5: memref<64x64xbf16, #tpu.memory_space<vmem>>) attributes {dimension_semantics = [#tpu.dimension_semantics<parallel>], iteration_bounds = array<i64: 1>, scalar_prefetch = 0 : i64, scratch_operands = 1 : i64, tpu.core_type = #tpu.core_type<tc>, window_params = [{transform_indices = @transform_0, window_bounds = array<i64: 1, 64, 64>}, {pipeline_mode = #tpu.pipeline_mode<synchronous>, transform_indices = @transform_1, window_bounds = array<i64: 64, 192>}, {pipeline_mode = #tpu.pipeline_mode<synchronous>, transform_indices = @transform_2, window_bounds = array<i64: 64, 64>}, {transform_indices = @transform_3, window_bounds = array<i64: 1, 64, 64>}]} {
    %c0 = arith.constant 0 : index
    %c0_0 = arith.constant 0 : index
    %c0_1 = arith.constant 0 : index
    %0 = vector.load %arg1[%c0, %c0_0, %c0_1] : memref<1x64x64xbf16, #tpu.memory_space<vmem>>, vector<1x64x64xbf16>
    %1 = vector.shape_cast %0 : vector<1x64x64xbf16> to vector<64x64xbf16>
    %c0_2 = arith.constant 0 : index
    %c0_3 = arith.constant 0 : index
    %2 = vector.load %arg2[%c0_2, %c0_3] : memref<64x192xbf16, #tpu.memory_space<vmem>>, vector<64x192xbf16>
    %cst = arith.constant dense<0.000000e+00> : vector<64x192xf32>
    %3 = tpu.matmul %1, %2, %cst {dimension_numbers = #tpu.dot_dimension_numbers<[1], [0], [0], [1], [0, 0, 1, 1], [], []>} : vector<64x64xbf16>, vector<64x192xbf16>, vector<64x192xf32> -> vector<64x192xf32>
    %4 = vector.extract_strided_slice %3 {offsets = [0, 0], sizes = [64, 64], strides = [1, 1]} : vector<64x192xf32> to vector<64x64xf32>
    %cst_4 = arith.constant 2.500000e-01 : f32
    %5 = vector.broadcast %cst_4 : f32 to vector<64x64xf32>
    %6 = arith.mulf %4, %5 : vector<64x64xf32>
    %7 = arith.truncf %6 : vector<64x64xf32> to vector<64x64xbf16>
    %8 = vector.extract_strided_slice %3 {offsets = [0, 64], sizes = [64, 64], strides = [1, 1]} : vector<64x192xf32> to vector<64x64xf32>
    %9 = arith.truncf %8 : vector<64x64xf32> to vector<64x64xbf16>
    %10 = vector.extract_strided_slice %3 {offsets = [0, 128], sizes = [64, 64], strides = [1, 1]} : vector<64x192xf32> to vector<64x64xf32>
    %11 = arith.truncf %10 : vector<64x64xf32> to vector<64x64xbf16>
    %12 = tpu.iota {dimensions = array<i32: 0>} : vector<64x64xi32>
    %13 = tpu.iota {dimensions = array<i32: 1>} : vector<64x64xi32>
    %14 = arith.cmpi sle, %13, %12 : vector<64x64xi32>
    %15 = vector.extract_strided_slice %7 {offsets = [0, 0], sizes = [64, 16], strides = [1, 1]} : vector<64x64xbf16> to vector<64x16xbf16>
    %16 = vector.extract_strided_slice %9 {offsets = [0, 0], sizes = [64, 16], strides = [1, 1]} : vector<64x64xbf16> to vector<64x16xbf16>
    %17 = vector.extract_strided_slice %11 {offsets = [0, 0], sizes = [64, 16], strides = [1, 1]} : vector<64x64xbf16> to vector<64x16xbf16>
    %cst_5 = arith.constant dense<0.000000e+00> : vector<64x64xf32>
    %18 = tpu.matmul %15, %16, %cst_5 {dimension_numbers = #tpu.dot_dimension_numbers<[1], [1], [0], [0], [0, 0, 1, 0], [], []>} : vector<64x16xbf16>, vector<64x16xbf16>, vector<64x64xf32> -> vector<64x64xf32>
    %cst_6 = arith.constant -1.000000e+01 : f32
    %19 = vector.broadcast %cst_6 : f32 to vector<64x64xf32>
    %20 = arith.select %14, %18, %19 : vector<64x64xi1>, vector<64x64xf32>
    %cst_7 = arith.constant dense<0xFF800000> : vector<64xf32>
    %21 = vector.multi_reduction <maximumf>, %20, %cst_7 [1] : vector<64x64xf32> to vector<64xf32>
    %22 = vector.shape_cast %21 : vector<64xf32> to vector<64x1xf32>
    %23 = vector.broadcast %22 : vector<64x1xf32> to vector<64x64xf32>
    %24 = arith.subf %20, %23 : vector<64x64xf32>
    %25 = math.exp %24 : vector<64x64xf32>
    %cst_8 = arith.constant dense<0.000000e+00> : vector<64xf32>
    %26 = vector.multi_reduction <add>, %25, %cst_8 [1] : vector<64x64xf32> to vector<64xf32>
    %27 = vector.shape_cast %26 : vector<64xf32> to vector<64x1xf32>
    %28 = tpu.reciprocal %27 {approx = true} : vector<64x1xf32> -> vector<64x1xf32>
    %29 = vector.broadcast %28 : vector<64x1xf32> to vector<64x64xf32>
    %30 = arith.mulf %25, %29 : vector<64x64xf32>
    %31 = arith.truncf %30 : vector<64x64xf32> to vector<64x64xbf16>
    %cst_9 = arith.constant dense<0.000000e+00> : vector<64x16xf32>
    %32 = tpu.matmul %31, %17, %cst_9 {dimension_numbers = #tpu.dot_dimension_numbers<[1], [0], [0], [1], [0, 0, 1, 1], [], []>} : vector<64x64xbf16>, vector<64x16xbf16>, vector<64x16xf32> -> vector<64x16xf32>
    %33 = arith.truncf %32 : vector<64x16xf32> to vector<64x16xbf16>
    %c0_10 = arith.constant 0 : index
    %c0_11 = arith.constant 0 : index
    %34 = vector.load %arg5[%c0_10, %c0_11] : memref<64x64xbf16, #tpu.memory_space<vmem>>, vector<64x16xbf16>
    tpu.vector_store %arg5[%c0_10, %c0_11], %33 {strides = array<i32>} : memref<64x64xbf16, #tpu.memory_space<vmem>>, vector<64x16xbf16>,
    %35 = vector.extract_strided_slice %7 {offsets = [0, 16], sizes = [64, 16], strides = [1, 1]} : vector<64x64xbf16> to vector<64x16xbf16>
    %36 = vector.extract_strided_slice %9 {offsets = [0, 16], sizes = [64, 16], strides = [1, 1]} : vector<64x64xbf16> to vector<64x16xbf16>
    %37 = vector.extract_strided_slice %11 {offsets = [0, 16], sizes = [64, 16], strides = [1, 1]} : vector<64x64xbf16> to vector<64x16xbf16>
    %cst_12 = arith.constant dense<0.000000e+00> : vector<64x64xf32>
    %38 = tpu.matmul %35, %36, %cst_12 {dimension_numbers = #tpu.dot_dimension_numbers<[1], [1], [0], [0], [0, 0, 1, 0], [], []>} : vector<64x16xbf16>, vector<64x16xbf16>, vector<64x64xf32> -> vector<64x64xf32>
    %cst_13 = arith.constant -1.000000e+01 : f32
    %39 = vector.broadcast %cst_13 : f32 to vector<64x64xf32>
    %40 = arith.select %14, %38, %39 : vector<64x64xi1>, vector<64x64xf32>
    %cst_14 = arith.constant dense<0xFF800000> : vector<64xf32>
    %41 = vector.multi_reduction <maximumf>, %40, %cst_14 [1] : vector<64x64xf32> to vector<64xf32>
    %42 = vector.shape_cast %41 : vector<64xf32> to vector<64x1xf32>
    %43 = vector.broadcast %42 : vector<64x1xf32> to vector<64x64xf32>
    %44 = arith.subf %40, %43 : vector<64x64xf32>
    %45 = math.exp %44 : vector<64x64xf32>
    %cst_15 = arith.constant dense<0.000000e+00> : vector<64xf32>
    %46 = vector.multi_reduction <add>, %45, %cst_15 [1] : vector<64x64xf32> to vector<64xf32>
    %47 = vector.shape_cast %46 : vector<64xf32> to vector<64x1xf32>
    %48 = tpu.reciprocal %47 {approx = true} : vector<64x1xf32> -> vector<64x1xf32>
    %49 = vector.broadcast %48 : vector<64x1xf32> to vector<64x64xf32>
    %50 = arith.mulf %45, %49 : vector<64x64xf32>
    %51 = arith.truncf %50 : vector<64x64xf32> to vector<64x64xbf16>
    %cst_16 = arith.constant dense<0.000000e+00> : vector<64x16xf32>
    %52 = tpu.matmul %51, %37, %cst_16 {dimension_numbers = #tpu.dot_dimension_numbers<[1], [0], [0], [1], [0, 0, 1, 1], [], []>} : vector<64x64xbf16>, vector<64x16xbf16>, vector<64x16xf32> -> vector<64x16xf32>
    %53 = arith.truncf %52 : vector<64x16xf32> to vector<64x16xbf16>
    %c0_17 = arith.constant 0 : index
    %c16 = arith.constant 16 : index
    %54 = vector.load %arg5[%c0_17, %c16] : memref<64x64xbf16, #tpu.memory_space<vmem>>, vector<64x16xbf16>
    tpu.vector_store %arg5[%c0_17, %c16], %53 {strides = array<i32>} : memref<64x64xbf16, #tpu.memory_space<vmem>>, vector<64x16xbf16>,
    %55 = vector.extract_strided_slice %7 {offsets = [0, 32], sizes = [64, 16], strides = [1, 1]} : vector<64x64xbf16> to vector<64x16xbf16>
    %56 = vector.extract_strided_slice %9 {offsets = [0, 32], sizes = [64, 16], strides = [1, 1]} : vector<64x64xbf16> to vector<64x16xbf16>
    %57 = vector.extract_strided_slice %11 {offsets = [0, 32], sizes = [64, 16], strides = [1, 1]} : vector<64x64xbf16> to vector<64x16xbf16>
    %cst_18 = arith.constant dense<0.000000e+00> : vector<64x64xf32>
    %58 = tpu.matmul %55, %56, %cst_18 {dimension_numbers = #tpu.dot_dimension_numbers<[1], [1], [0], [0], [0, 0, 1, 0], [], []>} : vector<64x16xbf16>, vector<64x16xbf16>, vector<64x64xf32> -> vector<64x64xf32>
    %cst_19 = arith.constant -1.000000e+01 : f32
    %59 = vector.broadcast %cst_19 : f32 to vector<64x64xf32>
    %60 = arith.select %14, %58, %59 : vector<64x64xi1>, vector<64x64xf32>
    %cst_20 = arith.constant dense<0xFF800000> : vector<64xf32>
    %61 = vector.multi_reduction <maximumf>, %60, %cst_20 [1] : vector<64x64xf32> to vector<64xf32>
    %62 = vector.shape_cast %61 : vector<64xf32> to vector<64x1xf32>
    %63 = vector.broadcast %62 : vector<64x1xf32> to vector<64x64xf32>
    %64 = arith.subf %60, %63 : vector<64x64xf32>
    %65 = math.exp %64 : vector<64x64xf32>
    %cst_21 = arith.constant dense<0.000000e+00> : vector<64xf32>
    %66 = vector.multi_reduction <add>, %65, %cst_21 [1] : vector<64x64xf32> to vector<64xf32>
    %67 = vector.shape_cast %66 : vector<64xf32> to vector<64x1xf32>
    %68 = tpu.reciprocal %67 {approx = true} : vector<64x1xf32> -> vector<64x1xf32>
    %69 = vector.broadcast %68 : vector<64x1xf32> to vector<64x64xf32>
    %70 = arith.mulf %65, %69 : vector<64x64xf32>
    %71 = arith.truncf %70 : vector<64x64xf32> to vector<64x64xbf16>
    %cst_22 = arith.constant dense<0.000000e+00> : vector<64x16xf32>
    %72 = tpu.matmul %71, %57, %cst_22 {dimension_numbers = #tpu.dot_dimension_numbers<[1], [0], [0], [1], [0, 0, 1, 1], [], []>} : vector<64x64xbf16>, vector<64x16xbf16>, vector<64x16xf32> -> vector<64x16xf32>
    %73 = arith.truncf %72 : vector<64x16xf32> to vector<64x16xbf16>
    %c0_23 = arith.constant 0 : index
    %c32 = arith.constant 32 : index
    %74 = vector.load %arg5[%c0_23, %c32] : memref<64x64xbf16, #tpu.memory_space<vmem>>, vector<64x16xbf16>
    tpu.vector_store %arg5[%c0_23, %c32], %73 {strides = array<i32>} : memref<64x64xbf16, #tpu.memory_space<vmem>>, vector<64x16xbf16>,
    %75 = vector.extract_strided_slice %7 {offsets = [0, 48], sizes = [64, 16], strides = [1, 1]} : vector<64x64xbf16> to vector<64x16xbf16>
    %76 = vector.extract_strided_slice %9 {offsets = [0, 48], sizes = [64, 16], strides = [1, 1]} : vector<64x64xbf16> to vector<64x16xbf16>
    %77 = vector.extract_strided_slice %11 {offsets = [0, 48], sizes = [64, 16], strides = [1, 1]} : vector<64x64xbf16> to vector<64x16xbf16>
    %cst_24 = arith.constant dense<0.000000e+00> : vector<64x64xf32>
    %78 = tpu.matmul %75, %76, %cst_24 {dimension_numbers = #tpu.dot_dimension_numbers<[1], [1], [0], [0], [0, 0, 1, 0], [], []>} : vector<64x16xbf16>, vector<64x16xbf16>, vector<64x64xf32> -> vector<64x64xf32>
    %cst_25 = arith.constant -1.000000e+01 : f32
    %79 = vector.broadcast %cst_25 : f32 to vector<64x64xf32>
    %80 = arith.select %14, %78, %79 : vector<64x64xi1>, vector<64x64xf32>
    %cst_26 = arith.constant dense<0xFF800000> : vector<64xf32>
    %81 = vector.multi_reduction <maximumf>, %80, %cst_26 [1] : vector<64x64xf32> to vector<64xf32>
    %82 = vector.shape_cast %81 : vector<64xf32> to vector<64x1xf32>
    %83 = vector.broadcast %82 : vector<64x1xf32> to vector<64x64xf32>
    %84 = arith.subf %80, %83 : vector<64x64xf32>
    %85 = math.exp %84 : vector<64x64xf32>
    %cst_27 = arith.constant dense<0.000000e+00> : vector<64xf32>
    %86 = vector.multi_reduction <add>, %85, %cst_27 [1] : vector<64x64xf32> to vector<64xf32>
    %87 = vector.shape_cast %86 : vector<64xf32> to vector<64x1xf32>
    %88 = tpu.reciprocal %87 {approx = true} : vector<64x1xf32> -> vector<64x1xf32>
    %89 = vector.broadcast %88 : vector<64x1xf32> to vector<64x64xf32>
    %90 = arith.mulf %85, %89 : vector<64x64xf32>
    %91 = arith.truncf %90 : vector<64x64xf32> to vector<64x64xbf16>
    %cst_28 = arith.constant dense<0.000000e+00> : vector<64x16xf32>
    %92 = tpu.matmul %91, %77, %cst_28 {dimension_numbers = #tpu.dot_dimension_numbers<[1], [0], [0], [1], [0, 0, 1, 1], [], []>} : vector<64x64xbf16>, vector<64x16xbf16>, vector<64x16xf32> -> vector<64x16xf32>
    %93 = arith.truncf %92 : vector<64x16xf32> to vector<64x16xbf16>
    %c0_29 = arith.constant 0 : index
    %c48 = arith.constant 48 : index
    %94 = vector.load %arg5[%c0_29, %c48] : memref<64x64xbf16, #tpu.memory_space<vmem>>, vector<64x16xbf16>
    tpu.vector_store %arg5[%c0_29, %c48], %93 {strides = array<i32>} : memref<64x64xbf16, #tpu.memory_space<vmem>>, vector<64x16xbf16>,
    %c0_30 = arith.constant 0 : index
    %c0_31 = arith.constant 0 : index
    %95 = vector.load %arg5[%c0_30, %c0_31] : memref<64x64xbf16, #tpu.memory_space<vmem>>, vector<64x64xbf16>
    %c0_32 = arith.constant 0 : index
    %c0_33 = arith.constant 0 : index
    %96 = vector.load %arg3[%c0_32, %c0_33] : memref<64x64xbf16, #tpu.memory_space<vmem>>, vector<64x64xbf16>
    %cst_34 = arith.constant dense<0.000000e+00> : vector<64x64xf32>
    %97 = tpu.matmul %95, %96, %cst_34 {dimension_numbers = #tpu.dot_dimension_numbers<[1], [0], [0], [1], [0, 0, 1, 1], [], []>} : vector<64x64xbf16>, vector<64x64xbf16>, vector<64x64xf32> -> vector<64x64xf32>
    %c0_35 = arith.constant 0 : index
    %c0_36 = arith.constant 0 : index
    %c0_37 = arith.constant 0 : index
    %98 = vector.load %arg4[%c0_35, %c0_36, %c0_37] : memref<1x64x64xf32, #tpu.memory_space<vmem>>, vector<1x64x64xf32>
    %99 = vector.shape_cast %98 : vector<1x64x64xf32> to vector<64x64xf32>
    %100 = vector.shape_cast %97 : vector<64x64xf32> to vector<1x64x64xf32>
    tpu.vector_store %arg4[%c0_35, %c0_36, %c0_37], %100 {strides = array<i32>} : memref<1x64x64xf32, #tpu.memory_space<vmem>>, vector<1x64x64xf32>,
    return
  }
  func.func @transform_0(%arg0: i32) -> (i32, i32, i32) {
    %c0_i32 = arith.constant 0 : i32
    %c0_i32_0 = arith.constant 0 : i32
    %c0_i32_1 = arith.constant 0 : i32
    return %arg0, %c0_i32, %c0_i32_0 : i32, i32, i32
  }
  func.func @transform_1(%arg0: i32) -> (i32, i32) {
    %c0_i32 = arith.constant 0 : i32
    %c0_i32_0 = arith.constant 0 : i32
    %c0_i32_1 = arith.constant 0 : i32
    return %c0_i32, %c0_i32_0 : i32, i32
  }
  func.func @transform_2(%arg0: i32) -> (i32, i32) {
    %c0_i32 = arith.constant 0 : i32
    %c0_i32_0 = arith.constant 0 : i32
    %c0_i32_1 = arith.constant 0 : i32
    return %c0_i32, %c0_i32_0 : i32, i32
  }
  func.func @transform_3(%arg0: i32) -> (i32, i32, i32) {
    %c0_i32 = arith.constant 0 : i32
    %c0_i32_0 = arith.constant 0 : i32
    %c0_i32_1 = arith.constant 0 : i32
    return %arg0, %c0_i32, %c0_i32_0 : i32, i32, i32
  }
}

</mosaic_0001>

<bundles_post_ra>
// kernel: tpu_custom_call.1
= control target key start
LH: loop header
LB: loop body
LE: loop exit
PB: predicated region body
PF: predicated region fallthrough
CT: control target
= control target key end

     0   :  { %8 = vsyncpa [#allocation4], 0  ;;  %s3193_s0 = inlined_call_operand.hbm [shape: bf16[1,64,64], index: 0, kind: input, shape index: {}]   ;;  %s3194_s1 = inlined_call_operand.hbm [shape: bf16[64,192], index: 1, kind: input, shape index: {}]   ;;  %s3195_s2 = inlined_call_operand.hbm [shape: bf16[64,64], index: 2, kind: input, shape index: {}]   ;;  %s3196_s3 = inlined_call_operand.hbm [shape: f32[1,64,64], index: 3, kind: output, shape index: {}]  }
   0x1   :  { %9 = vsyncpa [#allocation7], 0 }
   0x2   :  { %10 = vsyncpa [#allocation5], 0  ;;  %s2419_s12 = smov [#allocation6]  }
   0x3   :  { %s28_s13 = sshll.u32 %s2419_s12, 4  ;;  %s29_s13 = int_to_ptr.vmem [resolvable:$true] %s28_s13 }
   0x4   :  { %s2341_s14 = scalar_lea.vmem %s29_s13, 1024  ;;  %p2346_p1 = scmp.lt.s32.totalorder %s29_s13, %s29_s13 }
   0x5   :  { %p2342_p0 = scmp.ne.s32.totalorder %s29_s13, %s2341_s14  ;;  %p2347_p2 = scmp.lt.s32.totalorder %s2341_s14, %s2341_s14 }
   0x7   :  { %p2348_p3 = por %p2347_p2, %p2346_p1 }
   0x9   :  { %p2349_p4 = pnand %p2348_p3, %p2342_p0 }
   0xb   :  { %2352 = shalt.err (!%p2349_p4)
}
   0xc   :  { %s2420_s15 = smov 128   ;;  %s2421_s16 = smov 8  }
   0xd   :  { %34 = dma.hbm_to_vmem [thread:$0]  %s3194_s1, 1024, %s29_s13, [#allocation7], %s2420_s15, %s2420_s15, %s2421_s16  }
   0xe   :  { %s2422_s19 = smov [#allocation3]  }
   0xf   :  { %s16_s20 = sshll.u32 %s2422_s19, 4  ;;  %s17_s20 = int_to_ptr.vmem [resolvable:$true] %s16_s20 }
  0x10   :  { %s2361_s21 = scalar_lea.vmem %s17_s20, 512  ;;  %p2366_p6 = scmp.lt.s32.totalorder %s17_s20, %s17_s20 }
  0x11   :  { %p2362_p5 = scmp.ne.s32.totalorder %s17_s20, %s2361_s21  ;;  %p2367_p7 = scmp.lt.s32.totalorder %s2361_s21, %s2361_s21 }
  0x13   :  { %p2368_p8 = por %p2367_p7, %p2366_p6 }
  0x15   :  { %p2369_p9 = pnand %p2368_p8, %p2362_p5 }
  0x17   :  { %2372 = shalt.err (!%p2369_p9)
}
  0x18   :  { %s2423_s22 = smov 64   ;;  %s2424_s23 = smov 4  }
  0x19   :  { %22 = dma.hbm_to_vmem [thread:$0]  %s3193_s0, 512, %s17_s20, [#allocation4], %s2423_s22, %s2423_s22, %s2424_s23  }
  0x1a   :  { %s2425_s26 = smov [#allocation8]  }
  0x1b   :  { %s40_s1 = sshll.u32 %s2425_s26, 4  ;;  %s41_s1 = int_to_ptr.vmem [resolvable:$true] %s40_s1 }
  0x1c   :  { %s2381_s27 = scalar_lea.vmem %s41_s1, 512  ;;  %p2386_p11 = scmp.lt.s32.totalorder %s41_s1, %s41_s1 }
  0x1d   :  { %p2382_p10 = scmp.ne.s32.totalorder %s41_s1, %s2381_s27  ;;  %p2387_p12 = scmp.lt.s32.totalorder %s2381_s27, %s2381_s27 }
  0x1f   :  { %p2388_p13 = por %p2387_p12, %p2386_p11 }
  0x21   :  { %p2389_p0 = pnand %p2388_p13, %p2382_p10 }
  0x23   :  { %2392 = shalt.err (!%p2389_p0)
}
  0x24   :  { %46 = dma.hbm_to_vmem [thread:$0]  %s3195_s2, 512, %s41_s1, [#allocation7], %s2423_s22, %s2423_s22, %s2424_s23  }
  0x25   :  { %2413 = dma.done.wait [#allocation4], 512  }
  0x26   :  { %2414 = vsyncadd [#allocation4], 4294966784 }
  0x27   :  { %2415 = dma.done.wait [#allocation7], 1536  }
  0x28   :  { %2416 = vsyncadd [#allocation7], 4294965760  ;;  %v2426_v0 = vmov 0   ;;  %v2181_v1 = vld [vmem:[#allocation6 + $0x34] ss:$8 sps:$4 sm:$0xff]   ;;  %v2193_v9 = vld [vmem:[#allocation3] sm:$0xff]  }
  0x29   :  { %178 = vmatprep.mubr.bf16.mxu0 %v2426_v0  ;;  %v2183_v2 = vld [vmem:[#allocation6 + $0x30] ss:$8 sps:$4 sm:$0xff]   ;;  %154 = vmatprep.subr.bf16.mxu0 %v2181_v1  ;;  %v2184_v3 = vld [vmem:[#allocation6 + $0x24] ss:$8 sps:$4 sm:$0xff]   ;;  %v2186_v4 = vld [vmem:[#allocation6 + $0x20] ss:$8 sps:$4 sm:$0xff]  }
  0x2a   :  { %155 = vmatpush1.bf16.msra.mxu0 %v2183_v2  ;;  %v2187_v5 = vld [vmem:[#allocation6 + $0x14] ss:$8 sps:$4 sm:$0xff]   ;;  %v2189_v6 = vld [vmem:[#allocation6 + $0x10] ss:$8 sps:$4 sm:$0xff]   ;;  %v2190_v7 = vld [vmem:[#allocation6 + $0x4] ss:$8 sps:$4 sm:$0xff]  }
  0x2b   :  { %156 = vmatprep.subr.bf16.mxu0 %v2184_v3  ;;  %v2192_v8 = vld [vmem:[#allocation6] ss:$8 sps:$4 sm:$0xff]   ;;  %vm133_vm0 = vcmask 523264   ;;  %v2195_v11 = vld [vmem:[#allocation3 + $0x10] sm:$0xff]   ;;  %v2196_v12 = vld [vmem:[#allocation3 + $0x18] sm:$0xff]   ;;  %vm270_vm1 = vcmask 130048  }
  0x2c   :  { %v2194_v10 = vld [vmem:[#allocation3 + $0x8] sm:$0xff]   ;;  %s2427_s0 = smov 48   ;;  %s2428_s2 = smov 112   ;;  %vm569_vm10 = vcmask 125952   ;;  %vm928_vm11 = vcmask 257152   ;;  %vm1279_vm12 = vcmask 388352  }
  0x2d   :  { %s2429_s30 = smov 32   ;;  %s2430_s4 = smov 96   ;;  %vm1630_vm13 = vcmask 519552  }
  0x2e   :  { %157 = vmatpush1.bf16.msra.mxu0 %v2186_v4  ;;  %s2431_s5 = smov 16   ;;  %s2432_s6 = smov 80  }
  0x2f   :  { %158 = vmatprep.subr.bf16.mxu0 %v2187_v5  ;;  %s2433_s7 = smov [#allocation9]  }
  0x30   :  { %s1789_s8 = sshll.u32 %s2433_s7, 4  ;;  %s1790_s8 = int_to_ptr.vmem [resolvable:$true] %s1789_s8 }
  0x31   :  { %s2393_s9 = scalar_lea.vmem %s1790_s8, 1024  ;;  %p2398_p2 = scmp.lt.s32.totalorder %s1790_s8, %s1790_s8 }
  0x32   :  { %159 = vmatpush1.bf16.msra.mxu0 %v2189_v6  ;;  %v239_v6 = vlaneseq  ;;  %p2394_p1 = scmp.ne.s32.totalorder %s1790_s8, %s2393_s9  ;;  %p2399_p3 = scmp.lt.s32.totalorder %s2393_s9, %s2393_s9 }
  0x33   :  { %160 = vmatprep.subr.bf16.mxu0 %v2190_v7 }
  0x34   :  { %v2563_v7 = vshrl.u32 %v239_v6, 7  ;;  %p2400_p4 = por %p2399_p3, %p2398_p2 }
  0x36   :  { %161 = vmatpush1.bf16.msra.mxu0 %v2192_v8  ;;  %v2566_v8 = vadd.s32 16, %v2563_v7  ;;  %p2401_p5 = pnand %p2400_p4, %p2394_p1 }
  0x39   :  { %1814 = vmatmul.mubr.msk.bf16.vlgmr.msra.gmra.mxu0 %vm133_vm0, %v2193_v9  ;;  %v2568_v9 = vand.u32 127, %v239_v6 }
  0x3a   :  { %188 = vmatprep.mubr.bf16.mxu0 %v2426_v0 }
  0x3b   :  { %vm252_vm2 = vcmp.le.s32.totalorder %v2568_v9, %v2566_v8  ;;  %vm250_vm3 = vcmp.le.s32.totalorder %v2568_v9, %v2563_v7 }
  0x41   :  { %1815 = vmatmul.mubr.msk.bf16.gmra.mxu0 %vm133_vm0, %v2194_v10 }
  0x42   :  { %198 = vmatprep.mubr.bf16.mxu0 %v2426_v0 }
  0x49   :  { %1816 = vmatmul.mubr.msk.bf16.gmra.mxu0 %vm133_vm0, %v2195_v11  ;;  %v2575_v11 = vadd.s32 24, %v2563_v7 }
  0x4a   :  { %208 = vmatprep.mubr.bf16.mxu0 %v2426_v0 }
  0x4b   :  { %vm253_vm4 = vcmp.le.s32.totalorder %v2568_v9, %v2575_v11 }
  0x51   :  { %1817 = vmatmul.mubr.msk.bf16.gmra.mxu0 %vm133_vm0, %v2196_v12  ;;  %v2578_v12 = vadd.s32 8, %v2563_v7 }
  0x53   :  { %vm251_vm5 = vcmp.le.s32.totalorder %v2568_v9, %v2578_v12 }
  0xf9   :  { %v180_v13 = vpop.f32.mrf.mxu0 }
  0xfa   :  { %v219_v16 = vmul.f32 0.25, %v180_v13 }
  0xfb   :  { %v182_v14 = vpop.f32.mrf.mxu0 }
  0xfd   :  { %v184_v15 = vpop.f32.mrf.mxu0 }
  0xfe   :  { %v220_v17 = vmul.f32 0.25, %v184_v15  ;;  %v2482_v26 = vpack.c.bf16 %v184_v15, %v180_v13 }
  0xff   :  { %v186_v18 = vpop.f32.mrf.mxu0 }
 0x100   :  { %v2474_v19 = vpack.c.bf16 %v220_v17, %v219_v16  ;;  %v2521_v45 = vpack.c.bf16 %v186_v18, %v182_v14  ;;  %v2588_v16 = vadd.s32 48, %v2563_v7 }
 0x101   :  { %v190_v20 = vpop.f32.mrf.mxu0 }
 0x102   :  { %2006 = vmatprep.mubr.msk.bf16.mxu1 %vm270_vm1, %v2474_v19  ;;  %v221_v34 = vmul.f32 0.25, %v190_v20  ;;  %vm256_vm6 = vcmp.le.s32.totalorder %v2568_v9, %v2588_v16 }
 0x103   :  { %v192_v21 = vpop.f32.mrf.mxu0 }
 0x105   :  { %v194_v22 = vpop.f32.mrf.mxu0 }
 0x106   :  { %v2478_v23 = vpack.c.bf16 %v194_v22, %v190_v20  ;;  %v222_v32 = vmul.f32 0.25, %v194_v22  ;;  %v2604_v22 = vadd.s32 32, %v2563_v7 }
 0x107   :  { %v196_v24 = vpop.f32.mrf.mxu0 }
 0x108   :  { %264 = vrot.lane.b32.xlu1 %v2478_v23, %s2423_s22  ;;  %v2492_v36 = vpack.c.bf16 %v222_v32, %v221_v34  ;;  %v2513_v44 = vpack.c.bf16 %v196_v24, %v192_v21  ;;  %v2607_v24 = vadd.s32 56, %v2563_v7  ;;  %vm254_vm7 = vcmp.le.s32.totalorder %v2568_v9, %v2604_v22 }
 0x109   :  { %v200_v25 = vpop.f32.mrf.mxu0 }
 0x10a   :  { %v223_v47 = vmul.f32 0.25, %v200_v25  ;;  %vm257_vm8 = vcmp.le.s32.totalorder %v2568_v9, %v2607_v24 }
 0x10b   :  { %v202_v27 = vpop.f32.mrf.mxu0 }
 0x10c   :  { %262 = vrot.lane.b32.xlu1 %v2482_v26, %s2423_s22 }
 0x10d   :  { %v204_v28 = vpop.f32.mrf.mxu0 }
 0x10e   :  { %v2486_v29 = vpack.c.bf16 %v204_v28, %v200_v25  ;;  %v224_v46 = vmul.f32 0.25, %v204_v28 }
 0x10f   :  { %v206_v30 = vpop.f32.mrf.mxu0 }
 0x110   :  { %594 = vrot.lane.b32.xlu1 %v2486_v29, %s2427_s0  ;;  %v2505_v43 = vpack.c.bf16 %v206_v30, %v202_v27  ;;  %v2530_v48 = vpack.c.bf16 %v224_v46, %v223_v47 }
 0x111   :  { %v210_v31 = vpop.f32.mrf.mxu0 }
 0x112   :  { %v225_v40 = vmul.f32 0.25, %v210_v31 }
 0x113   :  { %v212_v33 = vpop.f32.mrf.mxu0 }
 0x114   :  { %590 = vrot.lane.b32.xlu1 %v2482_v26, %s2427_s0 }
 0x115   :  { %v214_v35 = vpop.f32.mrf.mxu0 }
 0x116   :  { %v226_v37 = vmul.f32 0.25, %v214_v35  ;;  %v2494_v38 = vpack.c.bf16 %v214_v35, %v210_v31  ;;  %v2622_v31 = vadd.s32 40, %v2563_v7 }
 0x117   :  { %v216_v39 = vpop.f32.mrf.mxu0 }
 0x118   :  { %v2496_v41 = vpack.c.bf16 %v216_v39, %v212_v33  ;;  %584 = vrot.lane.b32.xlu1 %v2492_v36, %s2428_s2  ;;  %268 = vrot.lane.b32.xlu0 %v2494_v38, %s2423_s22  ;;  %v2502_v42 = vpack.c.bf16 %v226_v37, %v225_v40  ;;  %vm255_vm9 = vcmp.le.s32.totalorder %v2568_v9, %v2622_v31 }
 0x11a   :  { %2014 = vmatprep.subr.bf16.mxu0 %v2496_v41 }
 0x11b   :  { %2015 = vmatpush3.bf16.msra.mxu0 %v2496_v41 }
 0x11c   :  { %266 = vrot.lane.b32.xlu0 %v2486_v29, %s2423_s22  ;;  %588 = vrot.lane.b32.xlu1 %v2502_v42, %s2428_s2 }
 0x11d   :  { %2016 = vmatprep.subr.bf16.mxu0 %v2505_v43 }
 0x11f   :  { %2017 = vmatpush3.bf16.msra.mxu0 %v2505_v43 }
 0x120   :  { %596 = vrot.lane.b32.xlu0 %v2494_v38, %s2427_s0  ;;  %797 = vrot.lane.b32.xlu1 %v2496_v41, %s2428_s2 }
 0x121   :  { %2018 = vmatprep.subr.bf16.mxu0 %v2513_v44 }
 0x123   :  { %2019 = vmatpush3.bf16.msra.mxu0 %v2513_v44 }
 0x124   :  { %592 = vrot.lane.b32.xlu0 %v2478_v23, %s2427_s0  ;;  %2020 = vmatprep.subr.bf16.mxu0 %v2521_v45 }
 0x127   :  { %2021 = vmatpush3.bf16.msra.mxu0 %v2521_v45 }
 0x128   :  { %582 = vrot.lane.b32.xlu0 %v2474_v19, %s2428_s2 }
 0x12c   :  { %586 = vrot.lane.b32.xlu0 %v2530_v48, %s2428_s2 }
 0x17a   :  { %v265_v49 = vpop.permute.xlu1 %264 }
 0x17b   :  { %v287_v60 = vsel %vm270_vm1, %v265_v49, 0 }
 0x17e   :  { %v263_v50 = vpop.permute.xlu1 %262 }
 0x17f   :  { %v284_v61 = vsel %vm270_vm1, %v263_v50, 0 }
 0x182   :  { %v595_v51 = vpop.permute.xlu1 %594 }
 0x183   :  { %v617_v2 = vsel %vm270_vm1, %v595_v51, 0 }
 0x186   :  { %v591_v52 = vpop.permute.xlu1 %590 }
 0x187   :  { %v611_v4 = vsel %vm270_vm1, %v591_v52, 0 }
 0x18a   :  { %v585_v53 = vpop.permute.xlu1 %584  ;;  %v269_v54 = vpop.permute.xlu0 %268 }
 0x18b   :  { %2150 = vmatprep.subr.msk.bf16.mxu1 %vm270_vm1, %v269_v54  ;;  %v293_v55 = vsel %vm270_vm1, %v269_v54, 0 }
 0x18c   :  { %1999 = vmatpush3.bf16.xpose.msra.mxu1 %v293_v55 }
 0x18e   :  { %v267_v56 = vpop.permute.xlu0 %266  ;;  %v589_v57 = vpop.permute.xlu1 %588 }
 0x18f   :  { %2151 = vmatprep.subr.msk.bf16.mxu1 %vm270_vm1, %v267_v56  ;;  %v290_v59 = vsel %vm270_vm1, %v267_v56, 0 }
 0x192   :  { %v2537_v58 = vpop.permute.xlu1 %797  ;;  %v597_v62 = vpop.permute.xlu0 %596 }
 0x193   :  { %2046 = vmatprep.subr.bf16.mxu0 %v2537_v58  ;;  %v620_v63 = vsel %vm270_vm1, %v597_v62, 0 }
 0x194   :  { %2001 = vmatpush3.bf16.xpose.msra.mxu1 %v290_v59 }
 0x195   :  { %2152 = vmatprep.subr.msk.bf16.mxu1 %vm270_vm1, %v265_v49 }
 0x196   :  { %v593_v0 = vpop.permute.xlu0 %592 }
 0x197   :  { %v614_v3 = vsel %vm270_vm1, %v593_v0, 0 }
 0x19a   :  { %v583_v1 = vpop.permute.xlu0 %582 }
 0x19c   :  { %2003 = vmatpush3.bf16.xpose.msra.mxu1 %v287_v60 }
 0x19d   :  { %2153 = vmatprep.subr.msk.bf16.mxu1 %vm270_vm1, %v263_v50 }
 0x19e   :  { %v587_v5 = vpop.permute.xlu0 %586 }
 0x1a4   :  { %2005 = vmatpush3.bf16.xpose.msra.mxu1 %v284_v61 }
 0x1a5   :  { %2154 = vmatprep.subr.msk.bf16.mxu1 %vm270_vm1, %v597_v62 }
 0x1ab   :  { %2007 = vmatmul.mubr.msk.bf16.vlgmr.msra.gmra.mxu1 %vm270_vm1, %v2492_v36 }
 0x1ac   :  { %2010 = vmatprep.mubr.msk.bf16.mxu1 %vm270_vm1, %v2530_v48  ;;  %2031 = vmatpush3.bf16.xpose.msra.mxu1 %v620_v63 }
 0x1ad   :  { %2155 = vmatprep.subr.msk.bf16.mxu1 %vm270_vm1, %v595_v51 }
 0x1b3   :  { %2011 = vmatmul.mubr.msk.bf16.gmra.mxu1 %vm270_vm1, %v2502_v42 }
 0x1b4   :  { %2033 = vmatpush3.bf16.xpose.msra.mxu1 %v617_v2  ;;  %2038 = vmatprep.mubr.msk.bf16.mxu1 %vm270_vm1, %v583_v1 }
 0x1b5   :  { %2156 = vmatprep.subr.msk.bf16.mxu1 %vm270_vm1, %v593_v0 }
 0x1bc   :  { %2035 = vmatpush3.bf16.xpose.msra.mxu1 %v614_v3 }
 0x1bd   :  { %2157 = vmatprep.subr.msk.bf16.mxu1 %vm270_vm1, %v591_v52 }
 0x1c4   :  { %2037 = vmatpush3.bf16.xpose.msra.mxu1 %v611_v4 }
 0x1cb   :  { %2039 = vmatmul.mubr.msk.bf16.vlgmr.msra.gmra.mxu1 %vm270_vm1, %v585_v53 }
 0x1cc   :  { %2042 = vmatprep.mubr.msk.bf16.mxu1 %vm270_vm1, %v587_v5 }
 0x1d3   :  { %2043 = vmatmul.mubr.msk.bf16.gmra.mxu1 %vm270_vm1, %v589_v57 }
 0x26b   :  { %v2008_v10 = vpop.f32.mrf.mxu1 }
 0x26c   :  { %v2583_v13 = vsel %vm252_vm2, %v2008_v10, -10.0 }
 0x26d   :  { %v329_v14 = vpop.f32.mrf.mxu1  ;;  %v374_v15 = vsel %vm133_vm0, %v2583_v13, -inf }
 0x26e   :  { %v2593_v17 = vsel %vm250_vm3, %v329_v14, -10.0  ;;  %375 = vmax.xlane.f32.xlu0 %v374_v15 }
 0x26f   :  { %v2009_v18 = vpop.f32.mrf.mxu1  ;;  %v368_v21 = vsel %vm133_vm0, %v2593_v17, -inf }
 0x270   :  { %v2612_v25 = vsel %vm253_vm4, %v2009_v18, -10.0 }
 0x271   :  { %v332_v20 = vpop.f32.mrf.mxu1  ;;  %v377_v34 = vsel %vm133_vm0, %v2612_v25, -inf }
 0x272   :  { %v2617_v27 = vsel %vm251_vm5, %v332_v20, -10.0  ;;  %369 = vmax.xlane.f32.xlu0 %v368_v21 }
 0x273   :  { %v2012_v28 = vpop.f32.mrf.mxu1  ;;  %v371_v30 = vsel %vm133_vm0, %v2617_v27, -inf }
 0x274   :  { %v2627_v32 = vsel %vm256_vm6, %v2012_v28, -10.0  ;;  %372 = vmax.xlane.f32.xlu1 %v371_v30 }
 0x275   :  { %v345_v33 = vpop.f32.mrf.mxu1  ;;  %v386_v37 = vsel %vm133_vm0, %v2627_v32, -inf }
 0x276   :  { %378 = vmax.xlane.f32.xlu0 %v377_v34  ;;  %v2642_v39 = vsel %vm254_vm7, %v345_v33, -10.0 }
 0x277   :  { %v2013_v35 = vpop.f32.mrf.mxu1  ;;  %v380_v50 = vsel %vm133_vm0, %v2642_v39, -inf }
 0x278   :  { %v2647_v40 = vsel %vm257_vm8, %v2013_v35, -10.0  ;;  %387 = vmax.xlane.f32.xlu1 %v386_v37 }
 0x279   :  { %v348_v46 = vpop.f32.mrf.mxu1  ;;  %v389_v47 = vsel %vm133_vm0, %v2647_v40, -inf }
 0x27a   :  { %v2654_v49 = vsel %vm255_vm9, %v348_v46, -10.0  ;;  %390 = vmax.xlane.f32.xlu0 %v389_v47 }
 0x27b   :  { %v383_v51 = vsel %vm133_vm0, %v2654_v49, -inf }
 0x27c   :  { %381 = vmax.xlane.f32.xlu1 %v380_v50 }
 0x27e   :  { %384 = vmax.xlane.f32.xlu0 %v383_v51 }
 0x28b   :  { %v2040_v52 = vpop.f32.mrf.mxu1 }
 0x28c   :  { %v2663_v53 = vsel %vm252_vm2, %v2040_v52, -10.0 }
 0x28d   :  { %v656_v54 = vpop.f32.mrf.mxu1  ;;  %v701_v55 = vsel %vm133_vm0, %v2663_v53, -inf }
 0x28e   :  { %v2670_v56 = vsel %vm250_vm3, %v656_v54, -10.0  ;;  %702 = vmax.xlane.f32.xlu1 %v701_v55 }
 0x28f   :  { %v2041_v57 = vpop.f32.mrf.mxu1  ;;  %v695_v62 = vsel %vm133_vm0, %v2670_v56, -inf }
 0x290   :  { %v2675_v59 = vsel %vm253_vm4, %v2041_v57, -10.0 }
 0x291   :  { %v659_v60 = vpop.f32.mrf.mxu1  ;;  %v704_v61 = vsel %vm133_vm0, %v2675_v59, -inf }
 0x292   :  { %v2684_v63 = vsel %vm251_vm5, %v659_v60, -10.0  ;;  %705 = vmax.xlane.f32.xlu0 %v704_v61  ;;  %696 = vmax.xlane.f32.xlu1 %v695_v62 }
 0x293   :  { %v698_v0 = vsel %vm133_vm0, %v2684_v63, -inf  ;;  %v2044_v1 = vpop.f32.mrf.mxu1 }
 0x294   :  { %v2695_v3 = vsel %vm256_vm6, %v2044_v1, -10.0 }
 0x295   :  { %v672_v2 = vpop.f32.mrf.mxu1  ;;  %v713_v5 = vsel %vm133_vm0, %v2695_v3, -inf }
 0x296   :  { %699 = vmax.xlane.f32.xlu0 %v698_v0  ;;  %v2702_v6 = vsel %vm254_vm7, %v672_v2, -10.0 }
 0x297   :  { %v2045_v4 = vpop.f32.mrf.mxu1  ;;  %v707_v18 = vsel %vm133_vm0, %v2702_v6, -inf }
 0x298   :  { %v2707_v10 = vsel %vm257_vm8, %v2045_v4, -10.0 }
 0x299   :  { %v675_v14 = vpop.f32.mrf.mxu1  ;;  %v716_v15 = vsel %vm133_vm0, %v2707_v10, -inf }
 0x29a   :  { %v2716_v20 = vsel %vm255_vm9, %v675_v14, -10.0 }
 0x29b   :  { %v710_v21 = vsel %vm133_vm0, %v2716_v20, -inf }
 0x2a3   :  { %793 = vrot.lane.b32.xlu1 %v2513_v44, %s2428_s2 }
 0x2ac   :  { %795 = vrot.lane.b32.xlu0 %v2505_v43, %s2428_s2 }
 0x2c7   :  { %714 = vmax.xlane.f32.xlu1 %v713_v5 }
 0x2cb   :  { %717 = vmax.xlane.f32.xlu0 %v716_v15  ;;  %708 = vmax.xlane.f32.xlu1 %v707_v18 }
 0x2cf   :  { %711 = vmax.xlane.f32.xlu0 %v710_v21 }
 0x2f7   :  { %v376_v28 = vpop.xlane.xlu0 %375 }
 0x2f8   :  { %v394_v30 = vsub.f32 %v2583_v13, %v376_v28 }
 0x2fa   :  { %v404_v33 = vmul.f32 1.442695, %v394_v30 }
 0x2fb   :  { %v370_v34 = vpop.xlane.xlu0 %369 }
 0x2fc   :  { %2205 = vpow2.f32 %v404_v33  ;;  %v392_v35 = vsub.f32 %v2593_v17, %v370_v34 }
 0x2fd   :  { %v373_v37 = vpop.xlane.xlu1 %372 }
 0x2fe   :  { %v400_v46 = vmul.f32 1.442695, %v392_v35  ;;  %v393_v47 = vsub.f32 %v2617_v27, %v373_v37 }
 0x2ff   :  { %v379_v50 = vpop.xlane.xlu0 %378 }
 0x300   :  { %2207 = vpow2.f32 %v400_v46  ;;  %v395_v51 = vsub.f32 %v2612_v25, %v379_v50  ;;  %v402_v52 = vmul.f32 1.442695, %v393_v47 }
 0x301   :  { %v388_v54 = vpop.xlane.xlu1 %387 }
 0x302   :  { %v406_v55 = vmul.f32 1.442695, %v395_v51  ;;  %v398_v57 = vsub.f32 %v2627_v32, %v388_v54 }
 0x303   :  { %v391_v60 = vpop.xlane.xlu0 %390 }
 0x304   :  { %2209 = vpow2.f32 %v406_v55  ;;  %v412_v13 = vmul.f32 1.442695, %v398_v57  ;;  %v399_v61 = vsub.f32 %v2647_v40, %v391_v60 }
 0x305   :  { %2211 = vpow2.f32 %v402_v52  ;;  %v382_v17 = vpop.xlane.xlu1 %381 }
 0x306   :  { %2213 = vpow2.f32 %v412_v13  ;;  %v414_v62 = vmul.f32 1.442695, %v399_v61  ;;  %v396_v27 = vsub.f32 %v2642_v39, %v382_v17 }
 0x307   :  { %v385_v0 = vpop.xlane.xlu0 %384 }
 0x308   :  { %v408_v1 = vmul.f32 1.442695, %v396_v27  ;;  %v397_v25 = vsub.f32 %v2654_v49, %v385_v0  ;;  %2215 = vpow2.f32 %v414_v62 }
 0x309   :  { %v2728_v2 = vpop.eup %2205 }
 0x30a   :  { %2217 = vpow2.f32 %v408_v1  ;;  %v410_v32 = vmul.f32 1.442695, %v397_v25  ;;  %v422_v4 = vsel %vm133_vm0, %v2728_v2, 0.0 }
 0x30b   :  { %423 = vadd.xlane.f32.xlu1 %v422_v4 }
 0x30c   :  { %2219 = vpow2.f32 %v410_v32 }
 0x30d   :  { %v2732_v40 = vpop.eup %2207 }
 0x30e   :  { %v416_v5 = vsel %vm133_vm0, %v2732_v40, 0.0 }
 0x30f   :  { %417 = vadd.xlane.f32.xlu1 %v416_v5 }
 0x311   :  { %v2736_v39 = vpop.eup %2209 }
 0x312   :  { %v2738_v14 = vpop.eup %2211  ;;  %v425_v49 = vsel %vm133_vm0, %v2736_v39, 0.0 }
 0x313   :  { %v2742_v15 = vpop.eup %2213  ;;  %426 = vadd.xlane.f32.xlu0 %v425_v49  ;;  %v419_v28 = vsel %vm133_vm0, %v2738_v14, 0.0 }
 0x314   :  { %v434_v18 = vsel %vm133_vm0, %v2742_v15, 0.0 }
 0x315   :  { %435 = vadd.xlane.f32.xlu1 %v434_v18  ;;  %v2746_v21 = vpop.eup %2215 }
 0x316   :  { %v437_v46 = vsel %vm133_vm0, %v2746_v21, 0.0 }
 0x317   :  { %v2750_v30 = vpop.eup %2217  ;;  %420 = vadd.xlane.f32.xlu0 %v419_v28  ;;  %v703_v33 = vpop.xlane.xlu1 %702 }
 0x318   :  { %v721_v34 = vsub.f32 %v2663_v53, %v703_v33  ;;  %v428_v35 = vsel %vm133_vm0, %v2750_v30, 0.0 }
 0x319   :  { %429 = vadd.xlane.f32.xlu1 %v428_v35  ;;  %v2757_v47 = vpop.eup %2219 }
 0x31a   :  { %v731_v37 = vmul.f32 1.442695, %v721_v34  ;;  %v431_v57 = vsel %vm133_vm0, %v2757_v47, 0.0 }
 0x31b   :  { %v706_v50 = vpop.xlane.xlu0 %705  ;;  %438 = vadd.xlane.f32.xlu0 %v437_v46  ;;  %v697_v51 = vpop.xlane.xlu1 %696 }
 0x31c   :  { %2221 = vpow2.f32 %v731_v37  ;;  %v722_v52 = vsub.f32 %v2675_v59, %v706_v50  ;;  %v719_v54 = vsub.f32 %v2670_v56, %v697_v51 }
 0x31e   :  { %v733_v55 = vmul.f32 1.442695, %v722_v52  ;;  %v727_v53 = vmul.f32 1.442695, %v719_v54 }
 0x31f   :  { %v700_v60 = vpop.xlane.xlu0 %699  ;;  %432 = vadd.xlane.f32.xlu0 %v431_v57  ;;  %v2786_v25 = vpop.permute.xlu1 %793 }
 0x320   :  { %2223 = vpow2.f32 %v733_v55  ;;  %v720_v13 = vsub.f32 %v2684_v63, %v700_v60 }
 0x321   :  { %2225 = vpow2.f32 %v727_v53 }
 0x322   :  { %v729_v61 = vmul.f32 1.442695, %v720_v13 }
 0x323   :  { %v2788_v32 = vpop.permute.xlu0 %795 }
 0x324   :  { %2227 = vpow2.f32 %v729_v61 }
 0x329   :  { %v2764_v17 = vpop.eup %2221 }
 0x32a   :  { %v749_v59 = vsel %vm133_vm0, %v2764_v17, 0.0 }
 0x32b   :  { %750 = vadd.xlane.f32.xlu1 %v749_v59 }
 0x32d   :  { %v2768_v56 = vpop.eup %2223 }
 0x32e   :  { %v2770_v62 = vpop.eup %2225  ;;  %v752_v27 = vsel %vm133_vm0, %v2768_v56, 0.0 }
 0x32f   :  { %753 = vadd.xlane.f32.xlu0 %v752_v27  ;;  %v743_v63 = vsel %vm133_vm0, %v2770_v62, 0.0 }
 0x330   :  { %744 = vadd.xlane.f32.xlu1 %v743_v63 }
 0x331   :  { %v2776_v0 = vpop.eup %2227 }
 0x332   :  { %v746_v1 = vsel %vm133_vm0, %v2776_v0, 0.0 }
 0x333   :  { %747 = vadd.xlane.f32.xlu0 %v746_v1 }
 0x341   :  { %951 = vrot.lane.b32.xlu1 %v2494_v38, %s2429_s30 }
 0x345   :  { %949 = vrot.lane.b32.xlu1 %v2486_v29, %s2429_s30 }
 0x349   :  { %791 = vrot.lane.b32.xlu0 %v2521_v45, %s2428_s2 }
 0x350   :  { %v715_v4 = vpop.xlane.xlu1 %714 }
 0x351   :  { %v725_v5 = vsub.f32 %v2695_v3, %v715_v4 }
 0x353   :  { %v739_v49 = vmul.f32 1.442695, %v725_v5 }
 0x354   :  { %v718_v18 = vpop.xlane.xlu0 %717  ;;  %v709_v28 = vpop.xlane.xlu1 %708 }
 0x355   :  { %v726_v33 = vsub.f32 %v2707_v10, %v718_v18  ;;  %v723_v34 = vsub.f32 %v2702_v6, %v709_v28  ;;  %2229 = vpow2.f32 %v739_v49 }
 0x357   :  { %v735_v35 = vmul.f32 1.442695, %v723_v34  ;;  %v741_v37 = vmul.f32 1.442695, %v726_v33 }
 0x358   :  { %v712_v46 = vpop.xlane.xlu0 %711 }
 0x359   :  { %v724_v50 = vsub.f32 %v2716_v20, %v712_v46  ;;  %2231 = vpow2.f32 %v735_v35 }
 0x35a   :  { %2233 = vpow2.f32 %v741_v37 }
 0x35b   :  { %v737_v51 = vmul.f32 1.442695, %v724_v50 }
 0x35d   :  { %2235 = vpow2.f32 %v737_v51 }
 0x362   :  { %v2794_v52 = vpop.eup %2229 }
 0x363   :  { %v761_v54 = vsel %vm133_vm0, %v2794_v52, 0.0 }
 0x366   :  { %v2796_v3 = vpop.eup %2231 }
 0x367   :  { %v755_v6 = vsel %vm133_vm0, %v2796_v3, 0.0  ;;  %v2802_v10 = vpop.eup %2233 }
 0x368   :  { %762 = vadd.xlane.f32.xlu0 %v761_v54  ;;  %v764_v53 = vsel %vm133_vm0, %v2802_v10, 0.0 }
 0x369   :  { %756 = vadd.xlane.f32.xlu1 %v755_v6 }
 0x36a   :  { %v2804_v55 = vpop.eup %2235 }
 0x36b   :  { %v758_v20 = vsel %vm133_vm0, %v2804_v55, 0.0 }
 0x36c   :  { %759 = vadd.xlane.f32.xlu0 %v758_v20 }
 0x36d   :  { %765 = vadd.xlane.f32.xlu1 %v764_v53 }
 0x37e   :  { %945 = vrot.lane.b32.xlu1 %v2482_v26, %s2429_s30 }
 0x382   :  { %939 = vrot.lane.b32.xlu1 %v2492_v36, %s2430_s4  ;;  %947 = vrot.lane.b32.xlu0 %v2478_v23, %s2429_s30 }
 0x386   :  { %943 = vrot.lane.b32.xlu1 %v2502_v42, %s2430_s4  ;;  %937 = vrot.lane.b32.xlu0 %v2474_v19, %s2430_s4 }
 0x38a   :  { %1148 = vrot.lane.b32.xlu1 %v2496_v41, %s2430_s4  ;;  %941 = vrot.lane.b32.xlu0 %v2530_v48, %s2430_s4 }
 0x394   :  { %v424_v57 = vpop.xlane.xlu1 %423 }
 0x398   :  { %v418_v60 = vpop.xlane.xlu1 %417 }
 0x39c   :  { %v427_v13 = vpop.xlane.xlu0 %426 }
 0x39d   :  { %2237 = vrcp.f32 %v427_v13 }
 0x39e   :  { %v436_v61 = vpop.xlane.xlu1 %435  ;;  %2239 = vrcp.f32 %v418_v60 }
 0x39f   :  { %2241 = vrcp.f32 %v424_v57 }
 0x3a0   :  { %v421_v59 = vpop.xlane.xlu0 %420 }
 0x3a1   :  { %2243 = vrcp.f32 %v421_v59 }
 0x3a2   :  { %v430_v27 = vpop.xlane.xlu1 %429 }
 0x3a4   :  { %v439_v63 = vpop.xlane.xlu0 %438 }
 0x3a5   :  { %2245 = vrcp.f32 %v439_v63 }
 0x3a6   :  { %2247 = vrcp.f32 %v430_v27 }
 0x3a7   :  { %2249 = vrcp.f32 %v436_v61 }
 0x3a8   :  { %v433_v1 = vpop.xlane.xlu0 %432 }
 0x3a9   :  { %2251 = vrcp.f32 %v433_v1 }
 0x3aa   :  { %v2238_v4 = vpop.eup %2237 }
 0x3ab   :  { %v2240_v5 = vpop.eup %2239  ;;  %v451_v28 = vmul.f32 %v2238_v4, %v2736_v39 }
 0x3ac   :  { %v2242_v49 = vpop.eup %2241  ;;  %v448_v33 = vmul.f32 %v2240_v5, %v2732_v40 }
 0x3ad   :  { %v450_v35 = vmul.f32 %v2242_v49, %v2728_v2 }
 0x3ae   :  { %v2244_v18 = vpop.eup %2243 }
 0x3af   :  { %v449_v34 = vmul.f32 %v2244_v18, %v2738_v14  ;;  %v457_v46 = vpack.c.bf16 %v451_v28, %v450_v35 }
 0x3b1   :  { %v456_v37 = vpack.c.bf16 %v449_v34, %v448_v33 }
 0x3b2   :  { %v2246_v50 = vpop.eup %2245 }
 0x3b3   :  { %2022 = vmatprep.mubr.msk.bf16.mxu0 %vm133_vm0, %v456_v37  ;;  %v2248_v51 = vpop.eup %2247  ;;  %v455_v40 = vmul.f32 %v2246_v50, %v2746_v21 }
 0x3b4   :  { %v751_v54 = vpop.xlane.xlu1 %750  ;;  %2023 = vmatmul.mubr.msk.bf16.vlgmr.msra.gmra.mxu0 %vm133_vm0, %v457_v46  ;;  %v2250_v6 = vpop.eup %2249  ;;  %v452_v39 = vmul.f32 %v2248_v51, %v2750_v30 }
 0x3b5   :  { %2047 = vmatpush3.bf16.msra.mxu0 %v2537_v58  ;;  %v454_v53 = vmul.f32 %v2250_v6, %v2742_v15 }
 0x3b6   :  { %v2252_v20 = vpop.eup %2251  ;;  %2048 = vmatprep.subr.bf16.mxu0 %v2788_v32 }
 0x3b7   :  { %v453_v2 = vmul.f32 %v2252_v20, %v2757_v47  ;;  %v459_v58 = vpack.c.bf16 %v455_v40, %v454_v53 }
 0x3b8   :  { %v754_v14 = vpop.xlane.xlu0 %753 }
 0x3b9   :  { %v745_v57 = vpop.xlane.xlu1 %744  ;;  %2049 = vmatpush3.bf16.msra.mxu0 %v2788_v32  ;;  %v458_v60 = vpack.c.bf16 %v453_v2, %v452_v39  ;;  %2253 = vrcp.f32 %v754_v14 }
 0x3ba   :  { %2050 = vmatprep.subr.bf16.mxu0 %v2786_v25  ;;  %2255 = vrcp.f32 %v745_v57 }
 0x3bb   :  { %2026 = vmatprep.mubr.msk.bf16.mxu0 %vm133_vm0, %v458_v60  ;;  %2257 = vrcp.f32 %v751_v54 }
 0x3bc   :  { %v748_v21 = vpop.xlane.xlu0 %747  ;;  %2027 = vmatmul.mubr.msk.bf16.gmra.mxu0 %vm133_vm0, %v459_v58 }
 0x3bd   :  { %2259 = vrcp.f32 %v748_v21  ;;  %2051 = vmatpush3.bf16.msra.mxu0 %v2786_v25  ;;  %v952_v15 = vpop.permute.xlu1 %951 }
 0x3be   :  { %v975_v5 = vsel %vm270_vm1, %v952_v15, 0 }
 0x3c0   :  { %v792_v30 = vpop.permute.xlu0 %791 }
 0x3c1   :  { %2052 = vmatprep.subr.bf16.mxu0 %v792_v30  ;;  %v950_v49 = vpop.permute.xlu1 %949 }
 0x3c2   :  { %2053 = vmatpush3.bf16.msra.mxu0 %v792_v30 }
 0x3c3   :  { %2158 = vmatprep.subr.msk.bf16.mxu0 %vm270_vm1, %v952_v15 }
 0x3c6   :  { %v2254_v47 = vpop.eup %2253 }
 0x3c7   :  { %v2256_v32 = vpop.eup %2255  ;;  %v778_v59 = vmul.f32 %v2254_v47, %v2768_v56  ;;  %v972_v56 = vsel %vm270_vm1, %v950_v49, 0 }
 0x3c8   :  { %v2258_v13 = vpop.eup %2257  ;;  %v775_v27 = vmul.f32 %v2256_v32, %v2770_v62 }
 0x3c9   :  { %v777_v1 = vmul.f32 %v2258_v13, %v2764_v17 }
 0x3ca   :  { %v2260_v61 = vpop.eup %2259 }
 0x3cb   :  { %v776_v63 = vmul.f32 %v2260_v61, %v2776_v0  ;;  %v784_v25 = vpack.c.bf16 %v778_v59, %v777_v1 }
 0x3cd   :  { %v783_v4 = vpack.c.bf16 %v776_v63, %v775_v27 }
 0x3cf   :  { %2054 = vmatprep.mubr.msk.bf16.mxu0 %vm133_vm0, %v783_v4 }
 0x3d0   :  { %2055 = vmatmul.mubr.msk.bf16.vlgmr.msra.gmra.mxu0 %vm133_vm0, %v784_v25 }
 0x3d1   :  { %2063 = vmatpush3.bf16.xpose.msra.mxu0 %v975_v5 }
 0x3d2   :  { %2159 = vmatprep.subr.msk.bf16.mxu0 %vm270_vm1, %v950_v49 }
 0x3d9   :  { %2065 = vmatpush3.bf16.xpose.msra.mxu0 %v972_v56 }
 0x3f1   :  { %v763_v62 = vpop.xlane.xlu0 %762 }
 0x3f2   :  { %v757_v18 = vpop.xlane.xlu1 %756 }
 0x3f3   :  { %2261 = vrcp.f32 %v757_v18 }
 0x3f4   :  { %2263 = vrcp.f32 %v763_v62 }
 0x3f5   :  { %v760_v17 = vpop.xlane.xlu0 %759 }
 0x3f6   :  { %2265 = vrcp.f32 %v760_v17  ;;  %v766_v0 = vpop.xlane.xlu1 %765 }
 0x3f7   :  { %2267 = vrcp.f32 %v766_v0 }
 0x3f9   :  { %v948_v28 = vpop.permute.xlu0 %947 }
 0x3fa   :  { %v969_v33 = vsel %vm270_vm1, %v948_v28, 0  ;;  %v946_v34 = vpop.permute.xlu1 %945  ;;  %2160 = vmatprep.subr.msk.bf16.mxu0 %vm270_vm1, %v948_v28 }
 0x3fb   :  { %2067 = vmatpush3.bf16.xpose.msra.mxu0 %v969_v33  ;;  %v966_v50 = vsel %vm270_vm1, %v946_v34, 0 }
 0x3fc   :  { %2161 = vmatprep.subr.msk.bf16.mxu0 %vm270_vm1, %v946_v34 }
 0x3fd   :  { %v938_v60 = vpop.permute.xlu0 %937 }
 0x3fe   :  { %v940_v35 = vpop.permute.xlu1 %939 }
 0x400   :  { %v2262_v37 = vpop.eup %2261 }
 0x401   :  { %v2264_v46 = vpop.eup %2263  ;;  %v779_v20 = vmul.f32 %v2262_v37, %v2796_v3  ;;  %v942_v58 = vpop.permute.xlu0 %941 }
 0x402   :  { %v944_v51 = vpop.permute.xlu1 %943  ;;  %v781_v39 = vmul.f32 %v2264_v46, %v2794_v52 }
 0x403   :  { %v2266_v54 = vpop.eup %2265  ;;  %2069 = vmatpush3.bf16.xpose.msra.mxu0 %v966_v50 }
 0x404   :  { %v2268_v6 = vpop.eup %2267  ;;  %v780_v40 = vmul.f32 %v2266_v54, %v2804_v55 }
 0x405   :  { %v782_v2 = vmul.f32 %v2268_v6, %v2802_v10 }
 0x406   :  { %v1149_v14 = vpop.permute.xlu1 %1148  ;;  %v785_v53 = vpack.c.bf16 %v780_v40, %v779_v20 }
 0x407   :  { %2078 = vmatprep.subr.bf16.mxu1 %v1149_v14  ;;  %v786_v57 = vpack.c.bf16 %v782_v2, %v781_v39 }
 0x408   :  { %2079 = vmatpush3.bf16.msra.mxu1 %v1149_v14  ;;  %2058 = vmatprep.mubr.msk.bf16.mxu0 %vm133_vm0, %v785_v53 }
 0x409   :  { %2059 = vmatmul.mubr.msk.bf16.gmra.mxu0 %vm133_vm0, %v786_v57 }
 0x40a   :  { %2070 = vmatprep.mubr.msk.bf16.mxu0 %vm270_vm1, %v938_v60 }
 0x411   :  { %2071 = vmatmul.mubr.msk.bf16.vlgmr.msra.gmra.mxu0 %vm270_vm1, %v940_v35 }
 0x412   :  { %2074 = vmatprep.mubr.msk.bf16.mxu0 %vm270_vm1, %v942_v58 }
 0x419   :  { %2075 = vmatmul.mubr.msk.bf16.gmra.mxu0 %vm270_vm1, %v944_v51 }
 0x474   :  { %v2024_v52 = vpop.f32.mrf.mxu0 }
 0x475   :  { %v1896_v3 = vpack.c.bf16 %v2024_v52, %v2024_v52 }
 0x476   :  { %v506_v10 = vpop.f32.mrf.mxu0 }
 0x477   :  { %572 = vst.msk [vmem:[#allocation2 + $0x8] sm:$0xf] %vm569_vm10, %v1896_v3  ;;  %v1894_v55 = vpack.c.bf16 %v506_v10, %v506_v10 }
 0x478   :  { %v2025_v21 = vpop.f32.mrf.mxu0 }
 0x479   :  { %570 = vst.msk [vmem:[#allocation2] sm:$0xf] %vm569_vm10, %v1894_v55  ;;  %v1897_v30 = vpack.c.bf16 %v2025_v21, %v2025_v21 }
 0x47a   :  { %v509_v15 = vpop.f32.mrf.mxu0 }
 0x47b   :  { %573 = vst.msk [vmem:[#allocation2 + $0xc] sm:$0xf] %vm569_vm10, %v1897_v30  ;;  %v1895_v47 = vpack.c.bf16 %v509_v15, %v509_v15 }
 0x47c   :  { %v2028_v32 = vpop.f32.mrf.mxu0 }
 0x47d   :  { %571 = vst.msk [vmem:[#allocation2 + $0x4] sm:$0xf] %vm569_vm10, %v1895_v47  ;;  %v1900_v13 = vpack.c.bf16 %v2028_v32, %v2028_v32 }
 0x47e   :  { %v522_v61 = vpop.f32.mrf.mxu0 }
 0x47f   :  { %576 = vst.msk [vmem:[#allocation2 + $0x18] sm:$0xf] %vm569_vm10, %v1900_v13  ;;  %v1898_v59 = vpack.c.bf16 %v522_v61, %v522_v61 }
 0x480   :  { %v2029_v27 = vpop.f32.mrf.mxu0 }
 0x481   :  { %574 = vst.msk [vmem:[#allocation2 + $0x10] sm:$0xf] %vm569_vm10, %v1898_v59  ;;  %v1901_v63 = vpack.c.bf16 %v2029_v27, %v2029_v27 }
 0x482   :  { %v525_v1 = vpop.f32.mrf.mxu0 }
 0x483   :  { %577 = vst.msk [vmem:[#allocation2 + $0x1c] sm:$0xf] %vm569_vm10, %v1901_v63  ;;  %v1899_v4 = vpack.c.bf16 %v525_v1, %v525_v1 }
 0x485   :  { %575 = vst.msk [vmem:[#allocation2 + $0x14] sm:$0xf] %vm569_vm10, %v1899_v4 }
 0x490   :  { %v2873_v25 = vpop.f32.mrf.mxu0 }
 0x492   :  { %v2875_v5 = vpop.f32.mrf.mxu0 }
 0x494   :  { %v2877_v49 = vpop.f32.mrf.mxu0 }
 0x496   :  { %v2879_v56 = vpop.f32.mrf.mxu0 }
 0x4c9   :  { %v2881_v62 = vpop.f32.mrf.mxu0 }
 0x4cb   :  { %v2883_v18 = vpop.f32.mrf.mxu0 }
 0x4cd   :  { %v2885_v17 = vpop.f32.mrf.mxu0 }
 0x4cf   :  { %v2887_v0 = vpop.f32.mrf.mxu0 }
 0x4d1   :  { %v2072_v28 = vpop.f32.mrf.mxu0 }
 0x4d2   :  { %v1044_v33 = vsel %vm252_vm2, %v2072_v28, -10.0 }
 0x4d3   :  { %v1011_v34 = vpop.f32.mrf.mxu0  ;;  %v1056_v35 = vsel %vm133_vm0, %v1044_v33, -inf }
 0x4d4   :  { %v1042_v37 = vsel %vm250_vm3, %v1011_v34, -10.0  ;;  %1057 = vmax.xlane.f32.xlu0 %v1056_v35 }
 0x4d5   :  { %v2073_v46 = vpop.f32.mrf.mxu0  ;;  %v1050_v51 = vsel %vm133_vm0, %v1042_v37, -inf }
 0x4d6   :  { %v1045_v54 = vsel %vm253_vm4, %v2073_v46, -10.0 }
 0x4d7   :  { %v1014_v50 = vpop.f32.mrf.mxu0  ;;  %v1059_v14 = vsel %vm133_vm0, %v1045_v54, -inf }
 0x4d8   :  { %v1043_v6 = vsel %vm251_vm5, %v1014_v50, -10.0  ;;  %1051 = vmax.xlane.f32.xlu0 %v1050_v51 }
 0x4d9   :  { %v2076_v20 = vpop.f32.mrf.mxu0  ;;  %v1053_v40 = vsel %vm133_vm0, %v1043_v6, -inf }
 0x4da   :  { %v2907_v39 = vsel %vm256_vm6, %v2076_v20, -10.0  ;;  %1054 = vmax.xlane.f32.xlu1 %v1053_v40 }
 0x4db   :  { %v1027_v2 = vpop.f32.mrf.mxu0  ;;  %v1068_v57 = vsel %vm133_vm0, %v2907_v39, -inf }
 0x4dc   :  { %1060 = vmax.xlane.f32.xlu0 %v1059_v14  ;;  %v1046_v60 = vsel %vm254_vm7, %v1027_v2, -10.0 }
 0x4dd   :  { %v2077_v53 = vpop.f32.mrf.mxu0  ;;  %v1062_v55 = vsel %vm133_vm0, %v1046_v60, -inf }
 0x4de   :  { %v1049_v58 = vsel %vm257_vm8, %v2077_v53, -10.0  ;;  %1069 = vmax.xlane.f32.xlu1 %v1068_v57 }
 0x4df   :  { %v1030_v52 = vpop.f32.mrf.mxu0  ;;  %v1071_v3 = vsel %vm133_vm0, %v1049_v58, -inf }
 0x4e0   :  { %v1047_v10 = vsel %vm255_vm9, %v1030_v52, -10.0  ;;  %1072 = vmax.xlane.f32.xlu0 %v1071_v3 }
 0x4e1   :  { %v1065_v21 = vsel %vm133_vm0, %v1047_v10, -inf }
 0x4e2   :  { %1063 = vmax.xlane.f32.xlu1 %v1062_v55 }
 0x4e4   :  { %1066 = vmax.xlane.f32.xlu0 %v1065_v21 }
 0x4f3   :  { %1144 = vrot.lane.b32.xlu1 %v2513_v44, %s2430_s4 }
 0x4fa   :  { %1146 = vrot.lane.b32.xlu0 %v2505_v43, %s2430_s4 }
 0x55d   :  { %v1058_v30 = vpop.xlane.xlu0 %1057 }
 0x55e   :  { %v1076_v15 = vsub.f32 %v1044_v33, %v1058_v30 }
 0x560   :  { %v1086_v47 = vmul.f32 1.442695, %v1076_v15 }
 0x561   :  { %v1052_v32 = vpop.xlane.xlu0 %1051 }
 0x562   :  { %2269 = vpow2.f32 %v1086_v47  ;;  %v1074_v13 = vsub.f32 %v1042_v37, %v1052_v32 }
 0x563   :  { %v1055_v61 = vpop.xlane.xlu1 %1054 }
 0x564   :  { %v1082_v59 = vmul.f32 1.442695, %v1074_v13  ;;  %v1075_v27 = vsub.f32 %v1043_v6, %v1055_v61 }
 0x565   :  { %v1061_v63 = vpop.xlane.xlu0 %1060 }
 0x566   :  { %2271 = vpow2.f32 %v1082_v59  ;;  %v1077_v1 = vsub.f32 %v1045_v54, %v1061_v63  ;;  %v1084_v28 = vmul.f32 1.442695, %v1075_v27 }
 0x567   :  { %v1070_v4 = vpop.xlane.xlu1 %1069 }
 0x568   :  { %v1088_v34 = vmul.f32 1.442695, %v1077_v1  ;;  %v1080_v52 = vsub.f32 %v2907_v39, %v1070_v4 }
 0x569   :  { %v1073_v35 = vpop.xlane.xlu0 %1072 }
 0x56a   :  { %2273 = vpow2.f32 %v1088_v34  ;;  %v1081_v3 = vsub.f32 %v1049_v58, %v1073_v35  ;;  %v1094_v21 = vmul.f32 1.442695, %v1080_v52 }
 0x56b   :  { %2275 = vpow2.f32 %v1084_v28  ;;  %v1064_v46 = vpop.xlane.xlu1 %1063 }
 0x56c   :  { %v1078_v57 = vsub.f32 %v1046_v60, %v1064_v46  ;;  %v1096_v30 = vmul.f32 1.442695, %v1081_v3 }
 0x56d   :  { %v1067_v50 = vpop.xlane.xlu0 %1066 }
 0x56e   :  { %v1090_v55 = vmul.f32 1.442695, %v1078_v57  ;;  %v1079_v15 = vsub.f32 %v1047_v10, %v1067_v50 }
 0x56f   :  { %v2928_v51 = vpop.eup %2269  ;;  %v1145_v20 = vpop.permute.xlu1 %1144 }
 0x570   :  { %v1104_v33 = vsel %vm133_vm0, %v2928_v51, 0.0  ;;  %2277 = vpow2.f32 %v1090_v55  ;;  %v1092_v47 = vmul.f32 1.442695, %v1079_v15 }
 0x571   :  { %1105 = vadd.xlane.f32.xlu1 %v1104_v33  ;;  %v1147_v37 = vpop.permute.xlu0 %1146  ;;  %2279 = vpow2.f32 %v1094_v21 }
 0x572   :  { %2080 = vmatprep.subr.bf16.mxu1 %v1147_v37  ;;  %2281 = vpow2.f32 %v1096_v30 }
 0x573   :  { %v2932_v6 = vpop.eup %2271  ;;  %2081 = vmatpush3.bf16.msra.mxu1 %v1147_v37  ;;  %2283 = vpow2.f32 %v1092_v47 }
 0x574   :  { %2082 = vmatprep.subr.bf16.mxu1 %v1145_v20  ;;  %v1098_v54 = vsel %vm133_vm0, %v2932_v6, 0.0 }
 0x575   :  { %1099 = vadd.xlane.f32.xlu1 %v1098_v54 }
 0x577   :  { %v2274_v40 = vpop.eup %2273  ;;  %2083 = vmatpush3.bf16.msra.mxu1 %v1145_v20 }
 0x578   :  { %v1107_v2 = vsel %vm133_vm0, %v2274_v40, 0.0  ;;  %v2276_v14 = vpop.eup %2275 }
 0x579   :  { %1108 = vadd.xlane.f32.xlu0 %v1107_v2  ;;  %v1101_v53 = vsel %vm133_vm0, %v2276_v14, 0.0 }
 0x57d   :  { %1102 = vadd.xlane.f32.xlu0 %v1101_v53 }
 0x586   :  { %1302 = vrot.lane.b32.xlu1 %v2494_v38, %s2431_s5  ;;  %v2945_v38 = vpop.eup %2277 }
 0x587   :  { %v2947_v32 = vpop.eup %2279 }
 0x588   :  { %v2951_v60 = vpop.eup %2281  ;;  %v1116_v58 = vsel %vm133_vm0, %v2947_v32, 0.0 }
 0x589   :  { %v1119_v39 = vsel %vm133_vm0, %v2951_v60, 0.0  ;;  %v2957_v10 = vpop.eup %2283 }
 0x58a   :  { %1300 = vrot.lane.b32.xlu1 %v2486_v29, %s2431_s5  ;;  %v1110_v29 = vsel %vm133_vm0, %v2945_v38, 0.0  ;;  %v1113_v13 = vsel %vm133_vm0, %v2957_v10, 0.0 }
 0x593   :  { %1142 = vrot.lane.b32.xlu0 %v2521_v45, %s2430_s4 }
 0x5ae   :  { %1111 = vadd.xlane.f32.xlu1 %v1110_v29 }
 0x5b2   :  { %1120 = vadd.xlane.f32.xlu1 %v1119_v39  ;;  %1117 = vadd.xlane.f32.xlu0 %v1116_v58 }
 0x5b6   :  { %1114 = vadd.xlane.f32.xlu0 %v1113_v13 }
 0x5c3   :  { %1296 = vrot.lane.b32.xlu1 %v2482_v26, %s2431_s5 }
 0x5c7   :  { %1290 = vrot.lane.b32.xlu1 %v2492_v36, %s2432_s6 }
 0x5cb   :  { %1294 = vrot.lane.b32.xlu1 %v2502_v42, %s2432_s6 }
 0x5cc   :  { %1298 = vrot.lane.b32.xlu0 %v2478_v23, %s2431_s5 }
 0x5d0   :  { %1288 = vrot.lane.b32.xlu0 %v2474_v19, %s2432_s6 }
 0x5d4   :  { %1292 = vrot.lane.b32.xlu0 %v2530_v48, %s2432_s6 }
 0x5fa   :  { %v1106_v61 = vpop.xlane.xlu1 %1105 }
 0x5fe   :  { %v1100_v59 = vpop.xlane.xlu1 %1099 }
 0x602   :  { %v1109_v27 = vpop.xlane.xlu0 %1108  ;;  %v1303_v42 = vpop.permute.xlu1 %1302 }
 0x603   :  { %2285 = vrcp.f32 %v1109_v27  ;;  %v1326_v50 = vsel %vm270_vm1, %v1303_v42, 0 }
 0x604   :  { %2287 = vrcp.f32 %v1100_v59 }
 0x605   :  { %2289 = vrcp.f32 %v1106_v61 }
 0x606   :  { %v1103_v26 = vpop.xlane.xlu0 %1102  ;;  %v1301_v33 = vpop.permute.xlu1 %1300 }
 0x607   :  { %2291 = vrcp.f32 %v1103_v26  ;;  %v1323_v37 = vsel %vm270_vm1, %v1301_v33, 0 }
 0x60a   :  { %v1143_v36 = vpop.permute.xlu0 %1142 }
 0x60b   :  { %2084 = vmatprep.subr.bf16.mxu1 %v1143_v36 }
 0x60c   :  { %2085 = vmatpush3.bf16.msra.mxu1 %v1143_v36 }
 0x60d   :  { %2162 = vmatprep.subr.msk.bf16.mxu1 %vm270_vm1, %v1303_v42 }
 0x610   :  { %v2286_v23 = vpop.eup %2285 }
 0x611   :  { %v2288_v63 = vpop.eup %2287  ;;  %v1133_v4 = vmul.f32 %v2286_v23, %v2274_v40 }
 0x612   :  { %v2290_v19 = vpop.eup %2289  ;;  %v1130_v48 = vmul.f32 %v2288_v63, %v2932_v6 }
 0x613   :  { %v1132_v34 = vmul.f32 %v2290_v19, %v2928_v51 }
 0x614   :  { %v2292_v1 = vpop.eup %2291 }
 0x615   :  { %v1131_v28 = vmul.f32 %v2292_v1, %v2276_v14  ;;  %v1139_v46 = vpack.c.bf16 %v1133_v4, %v1132_v34 }
 0x617   :  { %v1138_v35 = vpack.c.bf16 %v1131_v28, %v1130_v48 }
 0x619   :  { %2086 = vmatprep.mubr.msk.bf16.mxu1 %vm133_vm0, %v1138_v35 }
 0x61a   :  { %2087 = vmatmul.mubr.msk.bf16.vlgmr.msra.gmra.mxu1 %vm133_vm0, %v1139_v46 }
 0x61b   :  { %2095 = vmatpush3.bf16.xpose.msra.mxu1 %v1326_v50 }
 0x61c   :  { %2163 = vmatprep.subr.msk.bf16.mxu1 %vm270_vm1, %v1301_v33 }
 0x623   :  { %2097 = vmatpush3.bf16.xpose.msra.mxu1 %v1323_v37 }
 0x637   :  { %v1112_v20 = vpop.xlane.xlu1 %1111 }
 0x63b   :  { %v1121_v6 = vpop.xlane.xlu1 %1120  ;;  %v1118_v54 = vpop.xlane.xlu0 %1117 }
 0x63c   :  { %2293 = vrcp.f32 %v1121_v6 }
 0x63d   :  { %2295 = vrcp.f32 %v1118_v54 }
 0x63e   :  { %2297 = vrcp.f32 %v1112_v20 }
 0x63f   :  { %v1115_v51 = vpop.xlane.xlu0 %1114  ;;  %v1297_v14 = vpop.permute.xlu1 %1296 }
 0x640   :  { %2299 = vrcp.f32 %v1115_v51  ;;  %v1317_v3 = vsel %vm270_vm1, %v1297_v14, 0 }
 0x643   :  { %v1299_v40 = vpop.permute.xlu0 %1298  ;;  %v1291_v13 = vpop.permute.xlu1 %1290 }
 0x644   :  { %v1320_v2 = vsel %vm270_vm1, %v1299_v40, 0  ;;  %2164 = vmatprep.subr.msk.bf16.mxu1 %vm270_vm1, %v1299_v40 }
 0x645   :  { %2099 = vmatpush3.bf16.xpose.msra.mxu1 %v1320_v2 }
 0x646   :  { %2165 = vmatprep.subr.msk.bf16.mxu1 %vm270_vm1, %v1297_v14 }
 0x647   :  { %v1289_v58 = vpop.permute.xlu0 %1288 }
 0x649   :  { %v2294_v53 = vpop.eup %2293 }
 0x64a   :  { %v2296_v57 = vpop.eup %2295  ;;  %v1137_v30 = vmul.f32 %v2294_v53, %v2951_v60 }
 0x64b   :  { %v2298_v52 = vpop.eup %2297  ;;  %v1136_v21 = vmul.f32 %v2296_v57, %v2947_v32  ;;  %v1293_v61 = vpop.permute.xlu0 %1292 }
 0x64c   :  { %v1134_v15 = vmul.f32 %v2298_v52, %v2945_v38  ;;  %v1295_v32 = vpop.permute.xlu1 %1294 }
 0x64d   :  { %v2300_v55 = vpop.eup %2299  ;;  %2101 = vmatpush3.bf16.xpose.msra.mxu1 %v1317_v3  ;;  %v1141_v39 = vpack.c.bf16 %v1137_v30, %v1136_v21 }
 0x64e   :  { %v1135_v47 = vmul.f32 %v2300_v55, %v2957_v10 }
 0x650   :  { %v1140_v29 = vpack.c.bf16 %v1135_v47, %v1134_v15 }
 0x652   :  { %2090 = vmatprep.mubr.msk.bf16.mxu1 %vm133_vm0, %v1140_v29 }
 0x653   :  { %2091 = vmatmul.mubr.msk.bf16.gmra.mxu1 %vm133_vm0, %v1141_v39 }
 0x654   :  { %2102 = vmatprep.mubr.msk.bf16.mxu1 %vm270_vm1, %v1289_v58 }
 0x65b   :  { %2103 = vmatmul.mubr.msk.bf16.vlgmr.msra.gmra.mxu1 %vm270_vm1, %v1291_v13 }
 0x65c   :  { %2106 = vmatprep.mubr.msk.bf16.mxu1 %vm270_vm1, %v1293_v61 }
 0x663   :  { %2107 = vmatmul.mubr.msk.bf16.gmra.mxu1 %vm270_vm1, %v1295_v32 }
 0x6da   :  { %v2995_v38 = vpop.f32.mrf.mxu1 }
 0x6dc   :  { %v2997_v60 = vpop.f32.mrf.mxu1 }
 0x6de   :  { %v2999_v10 = vpop.f32.mrf.mxu1 }
 0x6e0   :  { %v3001_v59 = vpop.f32.mrf.mxu1 }
 0x713   :  { %v3003_v27 = vpop.f32.mrf.mxu1 }
 0x715   :  { %v3005_v26 = vpop.f32.mrf.mxu1 }
 0x717   :  { %v3007_v36 = vpop.f32.mrf.mxu1 }
 0x719   :  { %v3009_v42 = vpop.f32.mrf.mxu1 }
 0x71b   :  { %v2104_v23 = vpop.f32.mrf.mxu1 }
 0x71c   :  { %v1395_v48 = vsel %vm252_vm2, %v2104_v23, -10.0 }
 0x71d   :  { %v1362_v63 = vpop.f32.mrf.mxu1  ;;  %v1407_v46 = vsel %vm133_vm0, %v1395_v48, -inf }
 0x71e   :  { %v1393_v19 = vsel %vm250_vm3, %v1362_v63, -10.0 }
 0x71f   :  { %v2105_v1 = vpop.f32.mrf.mxu1  ;;  %v1401_v4 = vsel %vm133_vm0, %v1393_v19, -inf }
 0x720   :  { %1402 = vmax.xlane.f32.xlu0 %v1401_v4  ;;  %v1396_v7 = vsel %vm253_vm4, %v2105_v1, -10.0 }
 0x721   :  { %v1365_v28 = vpop.f32.mrf.mxu1  ;;  %v1410_v12 = vsel %vm133_vm0, %v1396_v7, -inf }
 0x722   :  { %v1394_v34 = vsel %vm251_vm5, %v1365_v28, -10.0 }
 0x723   :  { %v2108_v35 = vpop.f32.mrf.mxu1  ;;  %v1404_v50 = vsel %vm133_vm0, %v1394_v34, -inf }
 0x724   :  { %1408 = vmax.xlane.f32.xlu0 %v1407_v46  ;;  %1405 = vmax.xlane.f32.xlu1 %v1404_v50  ;;  %v1399_v6 = vsel %vm256_vm6, %v2108_v35, -10.0 }
 0x725   :  { %v1378_v33 = vpop.f32.mrf.mxu1  ;;  %v1419_v51 = vsel %vm133_vm0, %v1399_v6, -inf }
 0x726   :  { %v1397_v8 = vsel %vm254_vm7, %v1378_v33, -10.0 }
 0x727   :  { %v2109_v37 = vpop.f32.mrf.mxu1  ;;  %v1413_v20 = vsel %vm133_vm0, %v1397_v8, -inf }
 0x728   :  { %1411 = vmax.xlane.f32.xlu0 %v1410_v12  ;;  %1414 = vmax.xlane.f32.xlu1 %v1413_v20  ;;  %v1400_v40 = vsel %vm257_vm8, %v2109_v37, -10.0 }
 0x729   :  { %v1381_v11 = vpop.f32.mrf.mxu1  ;;  %v1422_v16 = vsel %vm133_vm0, %v1400_v40, -inf }
 0x72a   :  { %v1398_v54 = vsel %vm255_vm9, %v1381_v11, -10.0 }
 0x72b   :  { %v1416_v22 = vsel %vm133_vm0, %v1398_v54, -inf }
 0x72c   :  { %1420 = vmax.xlane.f32.xlu1 %v1419_v51  ;;  %1417 = vmax.xlane.f32.xlu0 %v1416_v22  ;;  %v1903_v51 = vpack.c.bf16 %v2879_v56, %v2879_v56  ;;  %v1907_v22 = vpack.c.bf16 %v2887_v0, %v2887_v0  ;;  %v1908_v56 = vpack.c.bf16 %v2881_v62, %v2881_v62 }
 0x72d   :  { %v1914_v62 = vpack.c.bf16 %v3005_v26, %v3005_v26  ;;  %v1917_v0 = vpack.c.bf16 %v3007_v36, %v3007_v36 }
 0x730   :  { %1423 = vmax.xlane.f32.xlu0 %v1422_v16 }
 0x73d   :  { %1499 = vrot.lane.b32.xlu1 %v2496_v41, %s2432_s6 }
 0x7a9   :  { %v1403_v2 = vpop.xlane.xlu0 %1402 }
 0x7aa   :  { %v1425_v14 = vsub.f32 %v1393_v19, %v1403_v2 }
 0x7ac   :  { %v1433_v3 = vmul.f32 1.442695, %v1425_v14 }
 0x7ad   :  { %v1406_v31 = vpop.xlane.xlu1 %1405  ;;  %v1409_v53 = vpop.xlane.xlu0 %1408 }
 0x7ae   :  { %v1427_v57 = vsub.f32 %v1395_v48, %v1409_v53  ;;  %v1426_v55 = vsub.f32 %v1394_v34, %v1406_v31 }
 0x7b0   :  { %v1437_v52 = vmul.f32 1.442695, %v1427_v57  ;;  %v1435_v15 = vmul.f32 1.442695, %v1426_v55 }
 0x7b1   :  { %v1415_v21 = vpop.xlane.xlu1 %1414  ;;  %v1412_v30 = vpop.xlane.xlu0 %1411 }
 0x7b2   :  { %v1428_v9 = vsub.f32 %v1396_v7, %v1412_v30  ;;  %2301 = vpow2.f32 %v1437_v52  ;;  %v1429_v47 = vsub.f32 %v1397_v8, %v1415_v21 }
 0x7b3   :  { %2303 = vpow2.f32 %v1433_v3 }
 0x7b4   :  { %v1439_v24 = vmul.f32 1.442695, %v1428_v9  ;;  %v1441_v13 = vmul.f32 1.442695, %v1429_v47 }
 0x7b5   :  { %v1421_v29 = vpop.xlane.xlu1 %1420  ;;  %v1418_v39 = vpop.xlane.xlu0 %1417 }
 0x7b6   :  { %v1431_v58 = vsub.f32 %v1399_v6, %v1421_v29  ;;  %2305 = vpow2.f32 %v1439_v24  ;;  %v1430_v61 = vsub.f32 %v1398_v54, %v1418_v39 }
 0x7b7   :  { %2307 = vpow2.f32 %v1435_v15 }
 0x7b8   :  { %v1445_v41 = vmul.f32 1.442695, %v1431_v58  ;;  %v1443_v1 = vmul.f32 1.442695, %v1430_v61 }
 0x7b9   :  { %v1500_v32 = vpop.permute.xlu1 %1499  ;;  %v1424_v23 = vpop.xlane.xlu0 %1423 }
 0x7ba   :  { %2309 = vpow2.f32 %v1445_v41  ;;  %v1432_v63 = vsub.f32 %v1400_v40, %v1424_v23  ;;  %2110 = vmatprep.subr.bf16.mxu0 %v1500_v32  ;;  %v1902_v40 = vpack.c.bf16 %v2875_v5, %v2875_v5  ;;  %v1904_v5 = vpack.c.bf16 %v2873_v25, %v2873_v25 }
 0x7bb   :  { %2111 = vmatpush3.bf16.msra.mxu0 %v1500_v32  ;;  %2311 = vpow2.f32 %v1441_v13  ;;  %v1910_v25 = vpack.c.bf16 %v2997_v60, %v2997_v60  ;;  %v1912_v60 = vpack.c.bf16 %v2995_v38, %v2995_v38 }
 0x7bc   :  { %v1447_v19 = vmul.f32 1.442695, %v1432_v63 }
 0x7be   :  { %2313 = vpow2.f32 %v1447_v19 }
 0x7bf   :  { %v3045_v4 = vpop.eup %2301  ;;  %2315 = vpow2.f32 %v1443_v1 }
 0x7c0   :  { %v1455_v48 = vsel %vm133_vm0, %v3045_v4, 0.0  ;;  %v3049_v28 = vpop.eup %2303 }
 0x7c1   :  { %1456 = vadd.xlane.f32.xlu1 %v1455_v48  ;;  %v1449_v35 = vsel %vm133_vm0, %v3049_v28, 0.0 }
 0x7c3   :  { %v3051_v34 = vpop.eup %2305 }
 0x7c4   :  { %v1458_v46 = vsel %vm133_vm0, %v3051_v34, 0.0  ;;  %v3057_v50 = vpop.eup %2307 }
 0x7c5   :  { %1450 = vadd.xlane.f32.xlu1 %v1449_v35  ;;  %1459 = vadd.xlane.f32.xlu0 %v1458_v46  ;;  %v1452_v8 = vsel %vm133_vm0, %v3057_v50, 0.0 }
 0x7c7   :  { %v3059_v7 = vpop.eup %2309 }
 0x7c8   :  { %v1467_v33 = vsel %vm133_vm0, %v3059_v7, 0.0  ;;  %v3065_v37 = vpop.eup %2311 }
 0x7c9   :  { %1468 = vadd.xlane.f32.xlu1 %v1467_v33  ;;  %1453 = vadd.xlane.f32.xlu0 %v1452_v8  ;;  %v1461_v6 = vsel %vm133_vm0, %v3065_v37, 0.0 }
 0x7cb   :  { %v3067_v12 = vpop.eup %2313 }
 0x7cc   :  { %v1470_v20 = vsel %vm133_vm0, %v3067_v12, 0.0  ;;  %v3073_v11 = vpop.eup %2315 }
 0x7cd   :  { %1462 = vadd.xlane.f32.xlu1 %v1461_v6  ;;  %1471 = vadd.xlane.f32.xlu0 %v1470_v20  ;;  %v1464_v54 = vsel %vm133_vm0, %v3073_v11, 0.0 }
 0x7d1   :  { %1465 = vadd.xlane.f32.xlu0 %v1464_v54  ;;  %v2197_v54 = vld [vmem:[#allocation8 + $0x18] sm:$0xff]  }
 0x7d2   :  { %2142 = vmatprep.subr.bf16.mxu1 %v2197_v54 }
 0x7d3   :  { %2146 = vmatpush3.bf16.msra.mxu1 %v2197_v54 }
 0x7de   :  { %1495 = vrot.lane.b32.xlu1 %v2513_v44, %s2432_s6  ;;  %v1905_v44 = vpack.c.bf16 %v2877_v49, %v2877_v49  ;;  %v1911_v49 = vpack.c.bf16 %v3001_v59, %v3001_v59 }
 0x7e2   :  { %1493 = vrot.lane.b32.xlu1 %v2521_v45, %s2432_s6  ;;  %v1906_v45 = vpack.c.bf16 %v2883_v18, %v2883_v18  ;;  %v1915_v18 = vpack.c.bf16 %v3009_v42, %v3009_v42 }
 0x7e6   :  { %906 = vrot.lane.b32.xlu1 %v1903_v51, %s2431_s5  ;;  %v2198_v51 = vld [vmem:[#allocation8 + $0x10] sm:$0xff]  }
 0x7e7   :  { %1497 = vrot.lane.b32.xlu0 %v2505_v43, %s2432_s6  ;;  %v1909_v43 = vpack.c.bf16 %v2885_v17, %v2885_v17  ;;  %v1913_v17 = vpack.c.bf16 %v2999_v10, %v2999_v10  ;;  %v1916_v10 = vpack.c.bf16 %v3003_v27, %v3003_v27  ;;  %2143 = vmatprep.subr.bf16.mxu1 %v2198_v51 }
 0x7e8   :  { %2147 = vmatpush3.bf16.msra.mxu1 %v2198_v51 }
 0x7ea   :  { %914 = vrot.lane.b32.xlu1 %v1907_v22, %s2431_s5  ;;  %v2199_v22 = vld [vmem:[#allocation8 + $0x8] sm:$0xff]  }
 0x7eb   :  { %904 = vrot.lane.b32.xlu0 %v1902_v40, %s2431_s5  ;;  %2144 = vmatprep.subr.bf16.mxu1 %v2199_v22 }
 0x7ec   :  { %2148 = vmatpush3.bf16.msra.mxu1 %v2199_v22 }
 0x7ee   :  { %910 = vrot.lane.b32.xlu1 %v1905_v44, %s2431_s5 }
 0x7ef   :  { %912 = vrot.lane.b32.xlu0 %v1906_v45, %s2431_s5 }
 0x7f2   :  { %918 = vrot.lane.b32.xlu1 %v1909_v43, %s2431_s5  ;;  %v2200_v43 = vld [vmem:[#allocation8] sm:$0xff]  }
 0x7f3   :  { %908 = vrot.lane.b32.xlu0 %v1904_v5, %s2431_s5  ;;  %2145 = vmatprep.subr.bf16.mxu1 %v2200_v43 }
 0x7f4   :  { %2149 = vmatpush3.bf16.msra.mxu1 %v2200_v43 }
 0x7f6   :  { %1257 = vrot.lane.b32.xlu1 %v1911_v49, %s2429_s30 }
 0x7f7   :  { %916 = vrot.lane.b32.xlu0 %v1908_v56, %s2431_s5 }
 0x7fa   :  { %1265 = vrot.lane.b32.xlu1 %v1915_v18, %s2429_s30 }
 0x7fb   :  { %1255 = vrot.lane.b32.xlu0 %v1910_v25, %s2429_s30 }
 0x7fe   :  { %1261 = vrot.lane.b32.xlu1 %v1913_v17, %s2429_s30 }
 0x7ff   :  { %1263 = vrot.lane.b32.xlu0 %v1914_v62, %s2429_s30 }
 0x802   :  { %1269 = vrot.lane.b32.xlu1 %v1917_v0, %s2429_s30 }
 0x803   :  { %1259 = vrot.lane.b32.xlu0 %v1912_v60, %s2429_s30 }
 0x807   :  { %1267 = vrot.lane.b32.xlu0 %v1916_v10, %s2429_s30 }
 0x84a   :  { %v1457_v59 = vpop.xlane.xlu1 %1456 }
 0x84e   :  { %v1451_v26 = vpop.xlane.xlu1 %1450  ;;  %v1460_v42 = vpop.xlane.xlu0 %1459 }
 0x84f   :  { %2317 = vrcp.f32 %v1451_v26 }
 0x852   :  { %v1469_v16 = vpop.xlane.xlu1 %1468  ;;  %v1454_v2 = vpop.xlane.xlu0 %1453 }
 0x853   :  { %2319 = vrcp.f32 %v1454_v2 }
 0x854   :  { %2321 = vrcp.f32 %v1460_v42 }
 0x855   :  { %2323 = vrcp.f32 %v1457_v59 }
 0x856   :  { %v1463_v36 = vpop.xlane.xlu1 %1462  ;;  %v1472_v14 = vpop.xlane.xlu0 %1471 }
 0x857   :  { %2325 = vrcp.f32 %v1463_v36 }
 0x85a   :  { %v1496_v38 = vpop.permute.xlu1 %1495  ;;  %v1466_v31 = vpop.xlane.xlu0 %1465 }
 0x85b   :  { %2327 = vrcp.f32 %v1466_v31 }
 0x85c   :  { %2329 = vrcp.f32 %v1472_v14  ;;  %v2318_v57 = vpop.eup %2317 }
 0x85d   :  { %2331 = vrcp.f32 %v1469_v16  ;;  %v1481_v30 = vmul.f32 %v2318_v57, %v3049_v28 }
 0x85e   :  { %v1494_v53 = vpop.permute.xlu1 %1493  ;;  %v1498_v27 = vpop.permute.xlu0 %1497 }
 0x85f   :  { %2112 = vmatprep.subr.bf16.mxu0 %v1498_v27 }
 0x860   :  { %2113 = vmatpush3.bf16.msra.mxu0 %v1498_v27  ;;  %v2320_v52 = vpop.eup %2319 }
 0x861   :  { %2114 = vmatprep.subr.bf16.mxu0 %v1496_v38  ;;  %v2322_v3 = vpop.eup %2321  ;;  %v1482_v9 = vmul.f32 %v2320_v52, %v3057_v50 }
 0x862   :  { %v907_v55 = vpop.permute.xlu1 %906  ;;  %v905_v21 = vpop.permute.xlu0 %904  ;;  %v1484_v47 = vmul.f32 %v2322_v3, %v3051_v34 }
 0x863   :  { %930 = vst.msk [vmem:[#allocation2 + $0x4] sm:$0xf] %vm928_vm11, %v907_v55  ;;  %929 = vst.msk [vmem:[#allocation2] sm:$0xf] %vm928_vm11, %v905_v21  ;;  %v2324_v24 = vpop.eup %2323  ;;  %v1489_v15 = vpack.c.bf16 %v1482_v9, %v1481_v30 }
 0x864   :  { %2115 = vmatpush3.bf16.msra.mxu0 %v1496_v38  ;;  %v2326_v29 = vpop.eup %2325  ;;  %v1483_v41 = vmul.f32 %v2324_v24, %v3045_v4 }
 0x865   :  { %2116 = vmatprep.subr.bf16.mxu0 %v1494_v53  ;;  %2118 = vmatprep.mubr.msk.bf16.mxu0 %vm133_vm0, %v1489_v15  ;;  %v1485_v32 = vmul.f32 %v2326_v29, %v3065_v37 }
 0x866   :  { %v913_v39 = vpop.permute.xlu0 %912  ;;  %v915_v58 = vpop.permute.xlu1 %914  ;;  %v1490_v61 = vpack.c.bf16 %v1484_v47, %v1483_v41 }
 0x867   :  { %933 = vst.msk [vmem:[#allocation2 + $0x10] sm:$0xf] %vm928_vm11, %v913_v39  ;;  %934 = vst.msk [vmem:[#allocation2 + $0x14] sm:$0xf] %vm928_vm11, %v915_v58 }
 0x868   :  { %v2328_v13 = vpop.eup %2327  ;;  %2117 = vmatpush3.bf16.msra.mxu0 %v1494_v53 }
 0x869   :  { %v1486_v23 = vmul.f32 %v2328_v13, %v3073_v11  ;;  %v2330_v63 = vpop.eup %2329  ;;  %2126 = vmatprep.subr.bf16.mxu0 %v2197_v54 }
 0x86a   :  { %v909_v19 = vpop.permute.xlu0 %908  ;;  %v911_v1 = vpop.permute.xlu1 %910  ;;  %v1488_v28 = vmul.f32 %v2330_v63, %v3067_v12 }
 0x86b   :  { %931 = vst.msk [vmem:[#allocation2 + $0x8] sm:$0xf] %vm928_vm11, %v909_v19  ;;  %932 = vst.msk [vmem:[#allocation2 + $0xc] sm:$0xf] %vm928_vm11, %v911_v1  ;;  %2119 = vmatmul.mubr.msk.bf16.vlgmr.msra.gmra.mxu0 %vm133_vm0, %v1490_v61  ;;  %v1491_v4 = vpack.c.bf16 %v1486_v23, %v1485_v32  ;;  %v2332_v48 = vpop.eup %2331 }
 0x86c   :  { %v1487_v46 = vmul.f32 %v2332_v48, %v3059_v7  ;;  %2127 = vmatpush3.bf16.msra.mxu0 %v2197_v54 }
 0x86d   :  { %2122 = vmatprep.mubr.msk.bf16.mxu0 %vm133_vm0, %v1491_v4  ;;  %2128 = vmatprep.subr.bf16.mxu0 %v2198_v51 }
 0x86e   :  { %v917_v34 = vpop.permute.xlu0 %916  ;;  %v919_v35 = vpop.permute.xlu1 %918  ;;  %v1492_v50 = vpack.c.bf16 %v1488_v28, %v1487_v46 }
 0x86f   :  { %935 = vst.msk [vmem:[#allocation2 + $0x18] sm:$0xf] %vm928_vm11, %v917_v34  ;;  %936 = vst.msk [vmem:[#allocation2 + $0x1c] sm:$0xf] %vm928_vm11, %v919_v35 }
 0x870   :  { %2129 = vmatpush3.bf16.msra.mxu0 %v2198_v51 }
 0x871   :  { %2130 = vmatprep.subr.bf16.mxu0 %v2199_v22 }
 0x872   :  { %v1256_v33 = vpop.permute.xlu0 %1255  ;;  %v1258_v8 = vpop.permute.xlu1 %1257 }
 0x873   :  { %1280 = vst.msk [vmem:[#allocation2] sm:$0xf] %vm1279_vm12, %v1256_v33  ;;  %1281 = vst.msk [vmem:[#allocation2 + $0x4] sm:$0xf] %vm1279_vm12, %v1258_v8  ;;  %2123 = vmatmul.mubr.msk.bf16.gmra.mxu0 %vm133_vm0, %v1492_v50 }
 0x874   :  { %2131 = vmatpush3.bf16.msra.mxu0 %v2199_v22 }
 0x875   :  { %2132 = vmatprep.subr.bf16.mxu0 %v2200_v43 }
 0x876   :  { %v1264_v37 = vpop.permute.xlu0 %1263  ;;  %v1266_v12 = vpop.permute.xlu1 %1265 }
 0x877   :  { %1284 = vst.msk [vmem:[#allocation2 + $0x10] sm:$0xf] %vm1279_vm12, %v1264_v37  ;;  %1285 = vst.msk [vmem:[#allocation2 + $0x14] sm:$0xf] %vm1279_vm12, %v1266_v12 }
 0x878   :  { %2133 = vmatpush3.bf16.msra.mxu0 %v2200_v43 }
 0x87a   :  { %v1260_v20 = vpop.permute.xlu0 %1259  ;;  %v1262_v6 = vpop.permute.xlu1 %1261 }
 0x87b   :  { %1282 = vst.msk [vmem:[#allocation2 + $0x8] sm:$0xf] %vm1279_vm12, %v1260_v20  ;;  %1283 = vst.msk [vmem:[#allocation2 + $0xc] sm:$0xf] %vm1279_vm12, %v1262_v6 }
 0x87e   :  { %v1268_v7 = vpop.permute.xlu0 %1267  ;;  %v1270_v11 = vpop.permute.xlu1 %1269 }
 0x87f   :  { %1286 = vst.msk [vmem:[#allocation2 + $0x18] sm:$0xf] %vm1279_vm12, %v1268_v7  ;;  %1287 = vst.msk [vmem:[#allocation2 + $0x1c] sm:$0xf] %vm1279_vm12, %v1270_v11 }
 0x92b   :  { %v2120_v40 = vpop.f32.mrf.mxu0 }
 0x92c   :  { %v1920_v44 = vpack.c.bf16 %v2120_v40, %v2120_v40 }
 0x92d   :  { %v1551_v45 = vpop.f32.mrf.mxu0 }
 0x92e   :  { %1610 = vrot.lane.b32.xlu0 %v1920_v44, %s2427_s0  ;;  %v1918_v49 = vpack.c.bf16 %v1551_v45, %v1551_v45 }
 0x92f   :  { %v2121_v5 = vpop.f32.mrf.mxu0 }
 0x930   :  { %v1921_v56 = vpack.c.bf16 %v2121_v5, %v2121_v5 }
 0x931   :  { %v1554_v18 = vpop.f32.mrf.mxu0 }
 0x932   :  { %1606 = vrot.lane.b32.xlu0 %v1918_v49, %s2427_s0  ;;  %1612 = vrot.lane.b32.xlu1 %v1921_v56, %s2427_s0  ;;  %v1919_v17 = vpack.c.bf16 %v1554_v18, %v1554_v18 }
 0x933   :  { %v2124_v25 = vpop.f32.mrf.mxu0 }
 0x934   :  { %v1924_v59 = vpack.c.bf16 %v2124_v25, %v2124_v25 }
 0x935   :  { %v1567_v62 = vpop.f32.mrf.mxu0 }
 0x936   :  { %v1922_v0 = vpack.c.bf16 %v1567_v62, %v1567_v62  ;;  %1608 = vrot.lane.b32.xlu1 %v1919_v17, %s2427_s0 }
 0x937   :  { %v2125_v60 = vpop.f32.mrf.mxu0 }
 0x938   :  { %1614 = vrot.lane.b32.xlu0 %v1922_v0, %s2427_s0  ;;  %v1925_v42 = vpack.c.bf16 %v2125_v60, %v2125_v60 }
 0x939   :  { %v1570_v10 = vpop.f32.mrf.mxu0 }
 0x93a   :  { %v1923_v26 = vpack.c.bf16 %v1570_v10, %v1570_v10 }
 0x93c   :  { %1618 = vrot.lane.b32.xlu0 %v1924_v59, %s2427_s0  ;;  %1616 = vrot.lane.b32.xlu1 %v1923_v26, %s2427_s0 }
 0x940   :  { %1620 = vrot.lane.b32.xlu1 %v1925_v42, %s2427_s0 }
 0x9a0   :  { %v1611_v16 = vpop.permute.xlu0 %1610 }
 0x9a1   :  { %1633 = vst.msk [vmem:[#allocation2 + $0x8] sm:$0xf] %vm1630_vm13, %v1611_v16 }
 0x9a4   :  { %v1607_v2 = vpop.permute.xlu0 %1606  ;;  %v1613_v36 = vpop.permute.xlu1 %1612 }
 0x9a5   :  { %1631 = vst.msk [vmem:[#allocation2] sm:$0xf] %vm1630_vm13, %v1607_v2  ;;  %1634 = vst.msk [vmem:[#allocation2 + $0xc] sm:$0xf] %vm1630_vm13, %v1613_v36 }
 0x9a8   :  { %v1609_v14 = vpop.permute.xlu1 %1608 }
 0x9a9   :  { %1632 = vst.msk [vmem:[#allocation2 + $0x4] sm:$0xf] %vm1630_vm13, %v1609_v14 }
 0x9aa   :  { %v1615_v38 = vpop.permute.xlu0 %1614 }
 0x9ab   :  { %1635 = vst.msk [vmem:[#allocation2 + $0x10] sm:$0xf] %vm1630_vm13, %v1615_v38 }
 0x9ac   :  { %v2202_v57 = vld [vmem:[#allocation2 + $0x8] sm:$0xff]  }
 0x9ae   :  { %v1619_v31 = vpop.permute.xlu0 %1618  ;;  %v1617_v53 = vpop.permute.xlu1 %1616 }
 0x9af   :  { %1637 = vst.msk [vmem:[#allocation2 + $0x18] sm:$0xf] %vm1630_vm13, %v1619_v31  ;;  %1636 = vst.msk [vmem:[#allocation2 + $0x14] sm:$0xf] %vm1630_vm13, %v1617_v53 }
 0x9b0   :  { %v2201_v27 = vld [vmem:[#allocation2] sm:$0xff]  }
 0x9b1   :  { %2134 = vmatprep.mubr.msk.bf16.mxu0 %vm133_vm0, %v2201_v27 }
 0x9b2   :  { %v1621_v52 = vpop.permute.xlu1 %1620  ;;  %2135 = vmatmul.mubr.msk.bf16.vlgmr.msra.gmra.mxu0 %vm133_vm0, %v2202_v57 }
 0x9b3   :  { %1638 = vst.msk [vmem:[#allocation2 + $0x1c] sm:$0xf] %vm1630_vm13, %v1621_v52 }
 0x9b6   :  { %v2203_v3 = vld [vmem:[#allocation2 + $0x10] sm:$0xff]  }
 0x9b7   :  { %2138 = vmatprep.mubr.msk.bf16.mxu1 %vm133_vm0, %v2203_v3 }
 0x9ba   :  { %v2204_v55 = vld [vmem:[#allocation2 + $0x18] sm:$0xff]  }
 0x9bb   :  { %2139 = vmatmul.mubr.msk.bf16.vlgmr.msra.gmra.mxu1 %vm133_vm0, %v2204_v55 }
 0xa72   :  { %v2136_v21 = vpop.f32.mrf.mxu0 }
 0xa73   :  { %1778 = vst.msk [vmem:[#allocation9 + $0x10] sm:$0xff] %vm133_vm0, %v2136_v21 }
 0xa74   :  { %v1745_v30 = vpop.f32.mrf.mxu0 }
 0xa75   :  { %1776 = vst.msk [vmem:[#allocation9] sm:$0xff] %vm133_vm0, %v1745_v30 }
 0xa76   :  { %v2137_v9 = vpop.f32.mrf.mxu0 }
 0xa77   :  { %1779 = vst.msk [vmem:[#allocation9 + $0x18] sm:$0xff] %vm133_vm0, %v2137_v9 }
 0xa78   :  { %v1748_v24 = vpop.f32.mrf.mxu0 }
 0xa79   :  { %1777 = vst.msk [vmem:[#allocation9 + $0x8] sm:$0xff] %vm133_vm0, %v1748_v24 }
 0xa7b   :  { %v2140_v15 = vpop.f32.mrf.mxu1 }
 0xa7c   :  { %1782 = vst.msk [vmem:[#allocation9 + $0x30] sm:$0xff] %vm133_vm0, %v2140_v15 }
 0xa7d   :  { %v1761_v47 = vpop.f32.mrf.mxu1 }
 0xa7e   :  { %1780 = vst.msk [vmem:[#allocation9 + $0x20] sm:$0xff] %vm133_vm0, %v1761_v47 }
 0xa7f   :  { %v2141_v29 = vpop.f32.mrf.mxu1 }
 0xa80   :  { %1783 = vst.msk [vmem:[#allocation9 + $0x38] sm:$0xff] %vm133_vm0, %v2141_v29 }
 0xa81   :  { %v1764_v39 = vpop.f32.mrf.mxu1 }
 0xa82   :  { %1781 = vst.msk [vmem:[#allocation9 + $0x28] sm:$0xff] %vm133_vm0, %v1764_v39 }
 0xa83   :  { %2404 = shalt.err (!%p2401_p5)
}
 0xa84   :  { %1795 = dma.vmem_to_hbm [thread:$0]  %s1790_s8, 1024, %s3196_s3, [#allocation5], %s2420_s15, %s2420_s15, %s2421_s16  }
 0xa85   :  { %2417 = dma.done.wait [#allocation5], 1024  }
 0xa86   :  { %2418 = vsyncadd [#allocation5], 4294966272 }
 0xa87   :  { %1799 = vsyncpa [#allocation4], 1 }
 0xa88   :  { %1800 = vsyncpa [#allocation7], 1 }
 0xa89   :  { %1801 = vsyncpa [#allocation5], 1 }

</bundles_post_ra>
